<compile_context>
chip_gen: v5e
topology: v5e:2x2
jax: 0.10.0
libtpu: 0.0.40
codegen_flags: <defaults>
</compile_context>

<pallas_src>
import functools

import jax
import jax.numpy as jnp
from jax import lax
from jax.experimental import pallas as pl
from jax.experimental.pallas import tpu as pltpu  # noqa: F401  (TPU backend assumed)

LANE = 128  # lane-dense padded feature width


# ---------------------------------------------------------------------------
# Fused Pallas kernel: whole GNet forward in one invocation, all data in VMEM
# ---------------------------------------------------------------------------

def _gnet_kernel(adj_ref, x_ref,
                 w1_ref, g1_ref, be1_ref,
                 w2_ref, g2_ref, be2_ref,
                 w3_ref, g3_ref, be3_ref,
                 wo_ref, bo_ref,
                 o_ref, *, eps):
    adj = adj_ref[...]                                    # [N, N] row-normalized adjacency

    def sage(h, w_cat_ref):
        # mean aggregation over in-neighbors: adj is pre-normalized, so A_norm @ H == mean_neigh(H)
        h_neigh = jnp.dot(adj, h, preferred_element_type=jnp.float32)
        # single fused MXU contraction: [N, 2C] @ [2C, C_out]  (W_self stacked over W_neigh)
        hk = jnp.concatenate([h, h_neigh], axis=1)
        return jnp.dot(hk, w_cat_ref[...], preferred_element_type=jnp.float32)

    def bn(x, g_ref, b_ref, relu):
        # BatchNorm1d with batch statistics (training mode), fused as conv epilogue in VMEM.
        mean = jnp.mean(x, axis=0, keepdims=True)
        c = x - mean
        var = jnp.mean(c * c, axis=0, keepdims=True)      # biased variance (PyTorch BN norm)
        y = c * lax.rsqrt(var + eps) * g_ref[...] + b_ref[...]
        return jnp.maximum(y, 0.0) if relu else y

    h = sage(x_ref[...], w1_ref)                          # layer1 (no bias: BN cancels it)
    h = bn(h, g1_ref, be1_ref, relu=False)                # layer1_norm (no ReLU after it)
    h = sage(h, w2_ref)                                   # hidden layer 0
    h = bn(h, g2_ref, be2_ref, relu=True)
    h = sage(h, w3_ref)                                   # hidden layer 1
    h = bn(h, g3_ref, be3_ref, relu=True)
    h = sage(h, wo_ref) + bo_ref[...]                     # out_layer1 (keeps its bias)
    o_ref[...] = h.astype(o_ref.dtype)


# ---------------------------------------------------------------------------
# Wrapper: pre-normalize adjacency, pad to lane-dense 128, one pallas_call
# ---------------------------------------------------------------------------

def _full_spec(a):
    return pl.BlockSpec(a.shape, lambda: (0,) * a.ndim)


def _pad_lanes(x, width=LANE):
    pad = width - x.shape[-1]
    if pad <= 0:
        return x
    return jnp.pad(x, [(0, 0)] * (x.ndim - 1) + [(0, pad)])


def gnet_forward(adj, features, params, out_ch):
    n = adj.shape[0]
    # one-time adjacency normalization (isolated nodes -> 0, i.e. zero mean aggregation)
    deg = jnp.sum(adj, axis=1, keepdims=True)
    inv_deg = jnp.where(deg > 0, 1.0 / jnp.maximum(deg, 1.0), 0.0)
    adj_norm = (adj * inv_deg).astype(jnp.float32)
    x = _pad_lanes(features.astype(jnp.float32))          # [N, 128] lane-dense

    flat = (adj_norm, x,
            params["w1"], params["g1"], params["b1"],
            params["w2"], params["g2"], params["b2"],
            params["w3"], params["g3"], params["b3"],
            params["wo"], params["bo"])

    out = pl.pallas_call(
        functools.partial(_gnet_kernel, eps=1e-5),
        out_shape=jax.ShapeDtypeStruct((n, LANE), jnp.float32),
        in_specs=[_full_spec(a) for a in flat],
        out_specs=pl.BlockSpec((n, LANE), lambda: (0, 0)),
    )(*flat)
    return out[:, :out_ch]                                # slice padded lanes back to out_ch


# ---------------------------------------------------------------------------
# Parameter init (matches original: SAGEConv W_self/W_neigh ~ U(-1/sqrt(fan_in), ...),
# zero bias, BN gamma=1 beta=0).  Weights are stored stacked + zero-padded to 128 lanes.
# ---------------------------------------------------------------------------

def _init_sage_cat(key, fan_in, fan_out, pad_in=LANE, pad_out=LANE):
    k1, k2 = jax.random.split(key)
    scale = 1.0 / jnp.sqrt(jnp.float32(fan_in))
    w_self = jax.random.uniform(k1, (fan_in, fan_out), jnp.float32, -scale, scale)
    w_neigh = jax.random.uniform(k2, (fan_in, fan_out), jnp.float32, -scale, scale)
    w_cat = jnp.zeros((2 * pad_in, pad_out), jnp.float32)
    w_cat = w_cat.at[:fan_in, :fan_out].set(w_self)
    w_cat = w_cat.at[pad_in:pad_in + fan_in, :fan_out].set(w_neigh)
    return w_cat


def init_gnet_params(key, in_ch, out_ch, n_hidden=64):
    # fixed topology from the spec: layer1, 2 hidden (conv+BN+ReLU) layers, out_layer1
    keys = jax.random.split(key, 4)
    ones = jnp.ones((1, LANE), jnp.float32)
    zeros = jnp.zeros((1, LANE), jnp.float32)
    return {
        "w1": _init_sage_cat(keys[0], in_ch, n_hidden), "g1": ones, "b1": zeros,
        "w2": _init_sage_cat(keys[1], n_hidden, n_hidden), "g2": ones, "b2": zeros,
        "w3": _init_sage_cat(keys[2], n_hidden, n_hidden), "g3": ones, "b3": zeros,
        "wo": _init_sage_cat(keys[3], n_hidden, out_ch), "bo": zeros,
    }


# ---------------------------------------------------------------------------
# Main
# ---------------------------------------------------------------------------

if __name__ == "__main__":
    key = jax.random.PRNGKey(0)
    k_graph, k_feat, k_param = jax.random.split(key, 3)

    n_nodes = 64
    in_ch = 16
    out_ch = 8

    # deterministic synthetic graph: dense adjacency, ~20% edge density
    adj = jax.random.bernoulli(k_graph, p=0.2, shape=(n_nodes, n_nodes)).astype(jnp.float32)
    features = jax.random.normal(k_feat, (n_nodes, in_ch), jnp.float32)
    params = init_gnet_params(k_param, in_ch, out_ch, n_hidden=64)

    out = gnet_forward(adj, features, params, out_ch)
    out = jax.block_until_ready(out)

    assert out.shape == (n_nodes, out_ch), out.shape
    assert bool(jnp.all(jnp.isfinite(out)))
    print("KERNEL_OK")
</pallas_src>

<mosaic_0001>
module attributes {stable_mosaic.version = 11 : i64} {
  func.func @_gnet_kernel(%arg0: memref<64x64xf32, #tpu.memory_space<vmem>>, %arg1: memref<64x128xf32, #tpu.memory_space<vmem>>, %arg2: memref<256x128xf32, #tpu.memory_space<vmem>>, %arg3: memref<1x128xf32, #tpu.memory_space<vmem>>, %arg4: memref<1x128xf32, #tpu.memory_space<vmem>>, %arg5: memref<256x128xf32, #tpu.memory_space<vmem>>, %arg6: memref<1x128xf32, #tpu.memory_space<vmem>>, %arg7: memref<1x128xf32, #tpu.memory_space<vmem>>, %arg8: memref<256x128xf32, #tpu.memory_space<vmem>>, %arg9: memref<1x128xf32, #tpu.memory_space<vmem>>, %arg10: memref<1x128xf32, #tpu.memory_space<vmem>>, %arg11: memref<256x128xf32, #tpu.memory_space<vmem>>, %arg12: memref<1x128xf32, #tpu.memory_space<vmem>>, %arg13: memref<64x128xf32, #tpu.memory_space<vmem>>) attributes {dimension_semantics = [], scalar_prefetch = 0 : i64, scratch_operands = 0 : i64, tpu.core_type = #tpu.core_type<tc>} {
    %c0 = arith.constant 0 : index
    %c0_0 = arith.constant 0 : index
    %0 = vector.load %arg0[%c0, %c0_0] : memref<64x64xf32, #tpu.memory_space<vmem>>, vector<64x64xf32>
    %c0_1 = arith.constant 0 : index
    %c0_2 = arith.constant 0 : index
    %1 = vector.load %arg1[%c0_1, %c0_2] : memref<64x128xf32, #tpu.memory_space<vmem>>, vector<64x128xf32>
    %cst = arith.constant dense<0.000000e+00> : vector<64x128xf32>
    %2 = tpu.matmul %0, %1, %cst {dimension_numbers = #tpu.dot_dimension_numbers<[1], [0], [0], [1], [0, 0, 1, 1], [], []>} : vector<64x64xf32>, vector<64x128xf32>, vector<64x128xf32> -> vector<64x128xf32>
    %3 = tpu.concatenate %1, %2 in 1 : vector<64x128xf32>, vector<64x128xf32> -> vector<64x256xf32>
    %c0_3 = arith.constant 0 : index
    %c0_4 = arith.constant 0 : index
    %4 = vector.load %arg2[%c0_3, %c0_4] : memref<256x128xf32, #tpu.memory_space<vmem>>, vector<256x128xf32>
    %cst_5 = arith.constant dense<0.000000e+00> : vector<64x128xf32>
    %5 = tpu.matmul %3, %4, %cst_5 {dimension_numbers = #tpu.dot_dimension_numbers<[1], [0], [0], [1], [0, 0, 1, 1], [], []>} : vector<64x256xf32>, vector<256x128xf32>, vector<64x128xf32> -> vector<64x128xf32>
    %cst_6 = arith.constant dense<0.000000e+00> : vector<128xf32>
    %6 = vector.multi_reduction <add>, %5, %cst_6 [0] : vector<64x128xf32> to vector<128xf32>
    %7 = vector.shape_cast %6 : vector<128xf32> to vector<1x128xf32>
    %cst_7 = arith.constant 6.400000e+01 : f32
    %8 = vector.broadcast %cst_7 : f32 to vector<1x128xf32>
    %9 = arith.divf %7, %8 : vector<1x128xf32>
    %10 = vector.broadcast %9 : vector<1x128xf32> to vector<64x128xf32>
    %11 = arith.subf %5, %10 : vector<64x128xf32>
    %12 = arith.mulf %11, %11 : vector<64x128xf32>
    %cst_8 = arith.constant dense<0.000000e+00> : vector<128xf32>
    %13 = vector.multi_reduction <add>, %12, %cst_8 [0] : vector<64x128xf32> to vector<128xf32>
    %14 = vector.shape_cast %13 : vector<128xf32> to vector<1x128xf32>
    %cst_9 = arith.constant 6.400000e+01 : f32
    %15 = vector.broadcast %cst_9 : f32 to vector<1x128xf32>
    %16 = arith.divf %14, %15 : vector<1x128xf32>
    %cst_10 = arith.constant 9.99999974E-6 : f32
    %17 = vector.broadcast %cst_10 : f32 to vector<1x128xf32>
    %18 = arith.addf %16, %17 : vector<1x128xf32>
    %19 = math.rsqrt %18 : vector<1x128xf32>
    %20 = vector.broadcast %19 : vector<1x128xf32> to vector<64x128xf32>
    %21 = arith.mulf %11, %20 : vector<64x128xf32>
    %c0_11 = arith.constant 0 : index
    %c0_12 = arith.constant 0 : index
    %22 = vector.load %arg3[%c0_11, %c0_12] : memref<1x128xf32, #tpu.memory_space<vmem>>, vector<1x128xf32>
    %23 = vector.broadcast %22 : vector<1x128xf32> to vector<64x128xf32>
    %24 = arith.mulf %21, %23 : vector<64x128xf32>
    %c0_13 = arith.constant 0 : index
    %c0_14 = arith.constant 0 : index
    %25 = vector.load %arg4[%c0_13, %c0_14] : memref<1x128xf32, #tpu.memory_space<vmem>>, vector<1x128xf32>
    %26 = vector.broadcast %25 : vector<1x128xf32> to vector<64x128xf32>
    %27 = arith.addf %24, %26 : vector<64x128xf32>
    %cst_15 = arith.constant dense<0.000000e+00> : vector<64x128xf32>
    %28 = tpu.matmul %0, %27, %cst_15 {dimension_numbers = #tpu.dot_dimension_numbers<[1], [0], [0], [1], [0, 0, 1, 1], [], []>} : vector<64x64xf32>, vector<64x128xf32>, vector<64x128xf32> -> vector<64x128xf32>
    %29 = tpu.concatenate %27, %28 in 1 : vector<64x128xf32>, vector<64x128xf32> -> vector<64x256xf32>
    %c0_16 = arith.constant 0 : index
    %c0_17 = arith.constant 0 : index
    %30 = vector.load %arg5[%c0_16, %c0_17] : memref<256x128xf32, #tpu.memory_space<vmem>>, vector<256x128xf32>
    %cst_18 = arith.constant dense<0.000000e+00> : vector<64x128xf32>
    %31 = tpu.matmul %29, %30, %cst_18 {dimension_numbers = #tpu.dot_dimension_numbers<[1], [0], [0], [1], [0, 0, 1, 1], [], []>} : vector<64x256xf32>, vector<256x128xf32>, vector<64x128xf32> -> vector<64x128xf32>
    %cst_19 = arith.constant dense<0.000000e+00> : vector<128xf32>
    %32 = vector.multi_reduction <add>, %31, %cst_19 [0] : vector<64x128xf32> to vector<128xf32>
    %33 = vector.shape_cast %32 : vector<128xf32> to vector<1x128xf32>
    %cst_20 = arith.constant 6.400000e+01 : f32
    %34 = vector.broadcast %cst_20 : f32 to vector<1x128xf32>
    %35 = arith.divf %33, %34 : vector<1x128xf32>
    %36 = vector.broadcast %35 : vector<1x128xf32> to vector<64x128xf32>
    %37 = arith.subf %31, %36 : vector<64x128xf32>
    %38 = arith.mulf %37, %37 : vector<64x128xf32>
    %cst_21 = arith.constant dense<0.000000e+00> : vector<128xf32>
    %39 = vector.multi_reduction <add>, %38, %cst_21 [0] : vector<64x128xf32> to vector<128xf32>
    %40 = vector.shape_cast %39 : vector<128xf32> to vector<1x128xf32>
    %cst_22 = arith.constant 6.400000e+01 : f32
    %41 = vector.broadcast %cst_22 : f32 to vector<1x128xf32>
    %42 = arith.divf %40, %41 : vector<1x128xf32>
    %cst_23 = arith.constant 9.99999974E-6 : f32
    %43 = vector.broadcast %cst_23 : f32 to vector<1x128xf32>
    %44 = arith.addf %42, %43 : vector<1x128xf32>
    %45 = math.rsqrt %44 : vector<1x128xf32>
    %46 = vector.broadcast %45 : vector<1x128xf32> to vector<64x128xf32>
    %47 = arith.mulf %37, %46 : vector<64x128xf32>
    %c0_24 = arith.constant 0 : index
    %c0_25 = arith.constant 0 : index
    %48 = vector.load %arg6[%c0_24, %c0_25] : memref<1x128xf32, #tpu.memory_space<vmem>>, vector<1x128xf32>
    %49 = vector.broadcast %48 : vector<1x128xf32> to vector<64x128xf32>
    %50 = arith.mulf %47, %49 : vector<64x128xf32>
    %c0_26 = arith.constant 0 : index
    %c0_27 = arith.constant 0 : index
    %51 = vector.load %arg7[%c0_26, %c0_27] : memref<1x128xf32, #tpu.memory_space<vmem>>, vector<1x128xf32>
    %52 = vector.broadcast %51 : vector<1x128xf32> to vector<64x128xf32>
    %53 = arith.addf %50, %52 : vector<64x128xf32>
    %cst_28 = arith.constant 0.000000e+00 : f32
    %54 = vector.broadcast %cst_28 : f32 to vector<64x128xf32>
    %55 = arith.maximumf %53, %54 : vector<64x128xf32>
    %cst_29 = arith.constant dense<0.000000e+00> : vector<64x128xf32>
    %56 = tpu.matmul %0, %55, %cst_29 {dimension_numbers = #tpu.dot_dimension_numbers<[1], [0], [0], [1], [0, 0, 1, 1], [], []>} : vector<64x64xf32>, vector<64x128xf32>, vector<64x128xf32> -> vector<64x128xf32>
    %57 = tpu.concatenate %55, %56 in 1 : vector<64x128xf32>, vector<64x128xf32> -> vector<64x256xf32>
    %c0_30 = arith.constant 0 : index
    %c0_31 = arith.constant 0 : index
    %58 = vector.load %arg8[%c0_30, %c0_31] : memref<256x128xf32, #tpu.memory_space<vmem>>, vector<256x128xf32>
    %cst_32 = arith.constant dense<0.000000e+00> : vector<64x128xf32>
    %59 = tpu.matmul %57, %58, %cst_32 {dimension_numbers = #tpu.dot_dimension_numbers<[1], [0], [0], [1], [0, 0, 1, 1], [], []>} : vector<64x256xf32>, vector<256x128xf32>, vector<64x128xf32> -> vector<64x128xf32>
    %cst_33 = arith.constant dense<0.000000e+00> : vector<128xf32>
    %60 = vector.multi_reduction <add>, %59, %cst_33 [0] : vector<64x128xf32> to vector<128xf32>
    %61 = vector.shape_cast %60 : vector<128xf32> to vector<1x128xf32>
    %cst_34 = arith.constant 6.400000e+01 : f32
    %62 = vector.broadcast %cst_34 : f32 to vector<1x128xf32>
    %63 = arith.divf %61, %62 : vector<1x128xf32>
    %64 = vector.broadcast %63 : vector<1x128xf32> to vector<64x128xf32>
    %65 = arith.subf %59, %64 : vector<64x128xf32>
    %66 = arith.mulf %65, %65 : vector<64x128xf32>
    %cst_35 = arith.constant dense<0.000000e+00> : vector<128xf32>
    %67 = vector.multi_reduction <add>, %66, %cst_35 [0] : vector<64x128xf32> to vector<128xf32>
    %68 = vector.shape_cast %67 : vector<128xf32> to vector<1x128xf32>
    %cst_36 = arith.constant 6.400000e+01 : f32
    %69 = vector.broadcast %cst_36 : f32 to vector<1x128xf32>
    %70 = arith.divf %68, %69 : vector<1x128xf32>
    %cst_37 = arith.constant 9.99999974E-6 : f32
    %71 = vector.broadcast %cst_37 : f32 to vector<1x128xf32>
    %72 = arith.addf %70, %71 : vector<1x128xf32>
    %73 = math.rsqrt %72 : vector<1x128xf32>
    %74 = vector.broadcast %73 : vector<1x128xf32> to vector<64x128xf32>
    %75 = arith.mulf %65, %74 : vector<64x128xf32>
    %c0_38 = arith.constant 0 : index
    %c0_39 = arith.constant 0 : index
    %76 = vector.load %arg9[%c0_38, %c0_39] : memref<1x128xf32, #tpu.memory_space<vmem>>, vector<1x128xf32>
    %77 = vector.broadcast %76 : vector<1x128xf32> to vector<64x128xf32>
    %78 = arith.mulf %75, %77 : vector<64x128xf32>
    %c0_40 = arith.constant 0 : index
    %c0_41 = arith.constant 0 : index
    %79 = vector.load %arg10[%c0_40, %c0_41] : memref<1x128xf32, #tpu.memory_space<vmem>>, vector<1x128xf32>
    %80 = vector.broadcast %79 : vector<1x128xf32> to vector<64x128xf32>
    %81 = arith.addf %78, %80 : vector<64x128xf32>
    %cst_42 = arith.constant 0.000000e+00 : f32
    %82 = vector.broadcast %cst_42 : f32 to vector<64x128xf32>
    %83 = arith.maximumf %81, %82 : vector<64x128xf32>
    %cst_43 = arith.constant dense<0.000000e+00> : vector<64x128xf32>
    %84 = tpu.matmul %0, %83, %cst_43 {dimension_numbers = #tpu.dot_dimension_numbers<[1], [0], [0], [1], [0, 0, 1, 1], [], []>} : vector<64x64xf32>, vector<64x128xf32>, vector<64x128xf32> -> vector<64x128xf32>
    %85 = tpu.concatenate %83, %84 in 1 : vector<64x128xf32>, vector<64x128xf32> -> vector<64x256xf32>
    %c0_44 = arith.constant 0 : index
    %c0_45 = arith.constant 0 : index
    %86 = vector.load %arg11[%c0_44, %c0_45] : memref<256x128xf32, #tpu.memory_space<vmem>>, vector<256x128xf32>
    %cst_46 = arith.constant dense<0.000000e+00> : vector<64x128xf32>
    %87 = tpu.matmul %85, %86, %cst_46 {dimension_numbers = #tpu.dot_dimension_numbers<[1], [0], [0], [1], [0, 0, 1, 1], [], []>} : vector<64x256xf32>, vector<256x128xf32>, vector<64x128xf32> -> vector<64x128xf32>
    %c0_47 = arith.constant 0 : index
    %c0_48 = arith.constant 0 : index
    %88 = vector.load %arg12[%c0_47, %c0_48] : memref<1x128xf32, #tpu.memory_space<vmem>>, vector<1x128xf32>
    %89 = vector.broadcast %88 : vector<1x128xf32> to vector<64x128xf32>
    %90 = arith.addf %87, %89 : vector<64x128xf32>
    %c0_49 = arith.constant 0 : index
    %c0_50 = arith.constant 0 : index
    %91 = vector.load %arg13[%c0_49, %c0_50] : memref<64x128xf32, #tpu.memory_space<vmem>>, vector<64x128xf32>
    tpu.vector_store %arg13[%c0_49, %c0_50], %90 {strides = array<i32>} : memref<64x128xf32, #tpu.memory_space<vmem>>, vector<64x128xf32>,
    return
  }
}

</mosaic_0001>

<bundles_post_ra>
// kernel: tpu_custom_call.1
= control target key start
LH: loop header
LB: loop body
LE: loop exit
PB: predicated region body
PF: predicated region fallthrough
CT: control target
= control target key end

     0   :  { %18 = vsyncpa [#allocation3], 0  ;;  %s1733_s0 = inlined_call_operand.hbm [shape: f32[64,64], index: 0, kind: input, shape index: {}]   ;;  %s1734_s1 = inlined_call_operand.hbm [shape: f32[64,128], index: 1, kind: input, shape index: {}]   ;;  %s1735_s2 = inlined_call_operand.hbm [shape: f32[256,128], index: 2, kind: input, shape index: {}]   ;;  %s1736_s3 = inlined_call_operand.vmem [shape: f32[1,128], index: 3, kind: input, shape index: {}]   ;;  %s1737_s4 = inlined_call_operand.vmem [shape: f32[1,128], index: 4, kind: input, shape index: {}]   ;;  %s1738_s5 = inlined_call_operand.hbm [shape: f32[256,128], index: 5, kind: input, shape index: {}]   ;;  %s1739_s6 = inlined_call_operand.vmem [shape: f32[1,128], index: 6, kind: input, shape index: {}]   ;;  %s1740_s7 = inlined_call_operand.vmem [shape: f32[1,128], index: 7, kind: input, shape index: {}]   ;;  %s1741_s8 = inlined_call_operand.hbm [shape: f32[256,128], index: 8, kind: input, shape index: {}]   ;;  %s1742_s9 = inlined_call_operand.vmem [shape: f32[1,128], index: 9, kind: input, shape index: {}]   ;;  %s1743_s10 = inlined_call_operand.vmem [shape: f32[1,128], index: 10, kind: input, shape index: {}]   ;;  %s1744_s11 = inlined_call_operand.hbm [shape: f32[256,128], index: 11, kind: input, shape index: {}]   ;;  %s1745_s12 = inlined_call_operand.vmem [shape: f32[1,128], index: 12, kind: input, shape index: {}]   ;;  %s1746_s13 = inlined_call_operand.hbm [shape: f32[64,128], index: 13, kind: output, shape index: {}]  }
   0x1   :  { %19 = vsyncpa [#allocation6], 0 }
   0x2   :  { %20 = vsyncpa [#allocation9], 0 }
   0x3   :  { %21 = vsyncpa [#allocation12], 0 }
   0x4   :  { %22 = vsyncpa [#allocation4], 0  ;;  %s40_s27 = sshll.u32 %s1734_s1, 4  ;;  %s1393_s28 = smov [#allocation5]   ;;  %s41_s27 = int_to_ptr.hbm [resolvable:$true] %s40_s27 }
   0x5   :  { %s42_s29 = sshll.u32 %s1393_s28, 4  ;;  %s70_s15 = sshll.u32 %s1738_s5, 4  ;;  %s43_s29 = int_to_ptr.vmem [resolvable:$true] %s42_s29  ;;  %s71_s15 = int_to_ptr.hbm [resolvable:$true] %s70_s15 }
   0x6   :  { %s1394_s16 = smov 128   ;;  %s1395_s17 = smov 8  }
   0x7   :  { %48 = dma.hbm_to_vmem [thread:$0]  %s41_s27, 1024, %s43_s29, [#allocation6], %s1394_s16, %s1394_s16, %s1395_s17  }
   0x8   :  { %s1396_s18 = smov [#allocation8]   ;;  %s27_s1 = sshll.u32 %s1733_s0, 4  ;;  %s28_s1 = int_to_ptr.hbm [resolvable:$true] %s27_s1 }
   0x9   :  { %s72_s19 = sshll.u32 %s1396_s18, 4  ;;  %s53_s23 = sshll.u32 %s1735_s2, 4  ;;  %s73_s19 = int_to_ptr.vmem [resolvable:$true] %s72_s19  ;;  %s54_s23 = int_to_ptr.hbm [resolvable:$true] %s53_s23 }
   0xa   :  { %78 = dma.hbm_to_vmem [thread:$0]  %s71_s15, 4096, %s73_s19, [#allocation9], %s1394_s16, %s1394_s16, %s1395_s17  }
   0xb   :  { %s1397_s24 = smov [#allocation2]   ;;  %s1398_s26 = smov [#allocation7]  }
   0xc   :  { %s29_s25 = sshll.u32 %s1397_s24, 4  ;;  %s55_s0 = sshll.u32 %s1398_s26, 4  ;;  %s30_s25 = int_to_ptr.vmem [resolvable:$true] %s29_s25  ;;  %s56_s0 = int_to_ptr.vmem [resolvable:$true] %s55_s0 }
   0xd   :  { %35 = dma.hbm_to_vmem [thread:$0]  %s28_s1, 1024, %s30_s25, [#allocation3], %s1394_s16, %s1394_s16, %s1395_s17  }
   0xe   :  { %s87_s29 = sshll.u32 %s1741_s8, 4  ;;  %s104_s14 = sshll.u32 %s1744_s11, 4  ;;  %s88_s29 = int_to_ptr.hbm [resolvable:$true] %s87_s29  ;;  %s105_s14 = int_to_ptr.hbm [resolvable:$true] %s104_s14 }
   0xf   :  { %61 = dma.hbm_to_vmem [thread:$0]  %s54_s23, 4096, %s56_s0, [#allocation6], %s1394_s16, %s1394_s16, %s1395_s17  }
  0x10   :  { %s1399_s15 = smov [#allocation10]   ;;  %s1400_s19 = smov [#allocation11]  }
  0x11   :  { %s89_s18 = sshll.u32 %s1399_s15, 4  ;;  %s106_s8 = sshll.u32 %s1400_s19, 4  ;;  %s90_s18 = int_to_ptr.vmem [resolvable:$true] %s89_s18  ;;  %s107_s8 = int_to_ptr.vmem [resolvable:$true] %s106_s8 }
  0x12   :  { %95 = dma.hbm_to_vmem [thread:$0]  %s88_s29, 4096, %s90_s18, [#allocation9], %s1394_s16, %s1394_s16, %s1395_s17  }
  0x13   :  { %112 = dma.hbm_to_vmem [thread:$0]  %s105_s14, 4096, %s107_s8, [#allocation12], %s1394_s16, %s1394_s16, %s1395_s17  }
  0x14   :  { %1383 = dma.done.wait [#allocation3], 1024  }
  0x15   :  { %1384 = vsyncadd [#allocation3], 4294966272 }
  0x16   :  { %1385 = dma.done.wait [#allocation6], 5120  }
  0x17   :  { %1386 = vsyncadd [#allocation6], 4294962176 }
  0x18   :  { %1387 = dma.done.wait [#allocation9], 8192  }
  0x19   :  { %1388 = vsyncadd [#allocation9], 4294959104 }
  0x1a   :  { %1389 = dma.done.wait [#allocation12], 4096  }
  0x1b   :  { %1390 = vsyncadd [#allocation12], 4294963200  ;;  %v1509_v0 = vld [vmem:[#allocation5 + $0x38] sm:$0xff]  ;;  %v1511_v1 = vld [vmem:[#allocation5 + $0x30] sm:$0xff]  ;;  %vm155_vm0 = vcmask 523264   ;;  %s1102_s27 = sshll.u32 %s1746_s13, 4  ;;  %s1103_s27 = int_to_ptr.hbm [resolvable:$true] %s1102_s27 }
  0x1c   :  { %188 = vmatpush.msra.mxu0 %v1509_v0  ;;  %v1514_v2 = vld [vmem:[#allocation5 + $0x28] sm:$0xff]  ;;  %v1517_v3 = vld [vmem:[#allocation5 + $0x20] sm:$0xff]  ;;  %v1520_v4 = vld [vmem:[#allocation5 + $0x18] sm:$0xff] }
  0x1d   :  { %v1523_v5 = vld [vmem:[#allocation5 + $0x10] sm:$0xff]  ;;  %v1526_v6 = vld [vmem:[#allocation5 + $0x8] sm:$0xff]  ;;  %v1529_v7 = vld [vmem:[#allocation5] sm:$0xff] }
  0x1e   :  { %189 = vmatpush.msra.mxu0 %v1511_v1  ;;  %v1532_v8 = vld [vmem:[#allocation2] sm:$0xff]  ;;  %v1537_v9 = vld [vmem:[#allocation2 + $0x8] sm:$0xff]  ;;  %v1541_v10 = vld [vmem:[#allocation2 + $0x10] sm:$0xff] }
  0x1f   :  { %v1545_v11 = vld [vmem:[#allocation2 + $0x18] sm:$0xff]  ;;  %v251_v13 = vld [vmem:[#allocation7 + $0xf0] sm:$0xff]  ;;  %v250_v16 = vld [vmem:[#allocation7 + $0xe8] sm:$0xff] }
  0x20   :  { %190 = vmatpush.msra.mxu0 %v1514_v2  ;;  %v252_v12 = vld [vmem:[#allocation7 + $0xf8] sm:$0xff]  ;;  %v235_v15 = vld [vmem:[#allocation7 + $0x70] sm:$0xff]  ;;  %v234_v17 = vld [vmem:[#allocation7 + $0x68] sm:$0xff] }
  0x21   :  { %294 = vmatpush.msra.mxu2 %v252_v12  ;;  %v236_v14 = vld [vmem:[#allocation7 + $0x78] sm:$0xff]  ;;  %v249_v18 = vld [vmem:[#allocation7 + $0xe0] sm:$0xff]  ;;  %v247_v23 = vld [vmem:[#allocation7 + $0xd0] sm:$0xff]  ;;  %v1401_v12 = vmov 64.0  }
  0x22   :  { %191 = vmatpush.msra.mxu0 %v1517_v3  ;;  %253 = vmatpush.msra.mxu1 %v236_v14  ;;  %v1549_v19 = vld [vmem:[#allocation2 + $0x20] sm:$0xff]  ;;  %v248_v21 = vld [vmem:[#allocation7 + $0xd8] sm:$0xff]  ;;  %v231_v24 = vld [vmem:[#allocation7 + $0x50] sm:$0xff]  ;;  %1199 = vrcp.f32 %v1401_v12 }
  0x23   :  { %295 = vmatpush.msra.mxu2 %v251_v13  ;;  %v233_v20 = vld [vmem:[#allocation7 + $0x60] sm:$0xff]  ;;  %v232_v22 = vld [vmem:[#allocation7 + $0x58] sm:$0xff]  ;;  %v246_v25 = vld [vmem:[#allocation7 + $0xc8] sm:$0xff] }
  0x24   :  { %192 = vmatpush.msra.mxu0 %v1520_v4  ;;  %254 = vmatpush.msra.mxu1 %v235_v15  ;;  %v230_v26 = vld [vmem:[#allocation7 + $0x48] sm:$0xff]  ;;  %v245_v27 = vld [vmem:[#allocation7 + $0xc0] sm:$0xff]  ;;  %v244_v30 = vld [vmem:[#allocation7 + $0xb8] sm:$0xff] }
  0x25   :  { %296 = vmatpush.msra.mxu2 %v250_v16  ;;  %v1553_v28 = vld [vmem:[#allocation2 + $0x28] sm:$0xff]  ;;  %v229_v29 = vld [vmem:[#allocation7 + $0x40] sm:$0xff]  ;;  %v228_v31 = vld [vmem:[#allocation7 + $0x38] sm:$0xff] }
  0x26   :  { %193 = vmatpush.msra.mxu0 %v1523_v5  ;;  %255 = vmatpush.msra.mxu1 %v234_v17  ;;  %v243_v32 = vld [vmem:[#allocation7 + $0xb0] sm:$0xff]  ;;  %v242_v34 = vld [vmem:[#allocation7 + $0xa8] sm:$0xff]  ;;  %v241_v36 = vld [vmem:[#allocation7 + $0xa0] sm:$0xff] }
  0x27   :  { %297 = vmatpush.msra.mxu2 %v249_v18  ;;  %v227_v33 = vld [vmem:[#allocation7 + $0x30] sm:$0xff]  ;;  %v226_v35 = vld [vmem:[#allocation7 + $0x28] sm:$0xff]  ;;  %v225_v38 = vld [vmem:[#allocation7 + $0x20] sm:$0xff] }
  0x28   :  { %194 = vmatpush.msra.mxu0 %v1526_v6  ;;  %256 = vmatpush.msra.mxu1 %v233_v20  ;;  %v1557_v37 = vld [vmem:[#allocation2 + $0x30] sm:$0xff]  ;;  %v240_v39 = vld [vmem:[#allocation7 + $0x98] sm:$0xff]  ;;  %v238_v41 = vld [vmem:[#allocation7 + $0x88] sm:$0xff]  ;;  %v1200_v18 = vpop.eup %1199 }
  0x29   :  { %298 = vmatpush.msra.mxu2 %v248_v21  ;;  %v239_v40 = vld [vmem:[#allocation7 + $0x90] sm:$0xff]  ;;  %v1561_v42 = vld [vmem:[#allocation2 + $0x38] sm:$0xff]  ;;  %v237_v44 = vld [vmem:[#allocation7 + $0x80] sm:$0xff]  ;;  %vm353_vm1 = vweird.f32 %v1200_v18 }
  0x2a   :  { %195 = vmatpush.msra.mxu0 %v1529_v7  ;;  %257 = vmatpush.msra.mxu1 %v232_v22  ;;  %v224_v43 = vld [vmem:[#allocation7 + $0x18] sm:$0xff]  ;;  %v223_v45 = vld [vmem:[#allocation7 + $0x10] sm:$0xff]  ;;  %v222_v46 = vld [vmem:[#allocation7 + $0x8] sm:$0xff] }
  0x2b   :  { %1118 = vmatmul.msk.f32.vlgmr.msra.gmra.mxu0 %vm155_vm0, %v1532_v8  ;;  %299 = vmatpush.msra.mxu2 %v247_v23  ;;  %v221_v47 = vld [vmem:[#allocation7] sm:$0xff] }
  0x2c   :  { %258 = vmatpush.msra.mxu1 %v231_v24 }
  0x2d   :  { %300 = vmatpush.msra.mxu2 %v246_v25  ;;  %v349_v25 = vmul.f32 64.0, %v1200_v18 }
  0x2e   :  { %259 = vmatpush.msra.mxu1 %v230_v26 }
  0x2f   :  { %301 = vmatpush.msra.mxu2 %v245_v27 }
  0x30   :  { %260 = vmatpush.msra.mxu1 %v229_v29 }
  0x31   :  { %302 = vmatpush.msra.mxu2 %v244_v30 }
  0x32   :  { %261 = vmatpush.msra.mxu1 %v228_v31  ;;  %v350_v31 = vsub.f32 1.0, %v349_v25  ;;  %v471_v25 = vld [vmem:[#allocation8 + $0x8] sm:$0xff] }
  0x33   :  { %1119 = vmatmul.msk.f32.gmra.mxu0 %vm155_vm0, %v1537_v9  ;;  %303 = vmatpush.msra.mxu2 %v243_v32 }
  0x34   :  { %262 = vmatpush.msra.mxu1 %v227_v33 }
  0x35   :  { %304 = vmatpush.msra.mxu2 %v242_v34  ;;  %v351_v34 = vmul.f32 %v1200_v18, %v350_v31 }
  0x36   :  { %263 = vmatpush.msra.mxu1 %v226_v35 }
  0x37   :  { %305 = vmatpush.msra.mxu2 %v241_v36 }
  0x38   :  { %264 = vmatpush.msra.mxu1 %v225_v38  ;;  %v352_v38 = vadd.f32 %v1200_v18, %v351_v34 }
  0x39   :  { %306 = vmatpush.msra.mxu2 %v240_v39 }
  0x3a   :  { %265 = vmatpush.msra.mxu1 %v224_v43  ;;  %v485_v43 = vld [vmem:[#allocation8 + $0x78] sm:$0xff] }
  0x3b   :  { %1120 = vmatmul.msk.f32.gmra.mxu0 %vm155_vm0, %v1541_v10  ;;  %307 = vmatpush.msra.mxu2 %v239_v40 }
  0x3c   :  { %266 = vmatpush.msra.mxu1 %v223_v45  ;;  %502 = vmatpush.msrb.mxu0 %v485_v43  ;;  %v484_v45 = vld [vmem:[#allocation8 + $0x70] sm:$0xff]  ;;  %v1192_v43 = vld [vmem:[%s1736_s3] ss:$0 sm:$0xff] }
  0x3d   :  { %308 = vmatpush.msra.mxu2 %v238_v41  ;;  %v1573_v41 = vsel %vm353_vm1, %v1200_v18, %v352_v38 }
  0x3e   :  { %267 = vmatpush.msra.mxu1 %v222_v46  ;;  %503 = vmatpush.msrb.mxu0 %v484_v45 }
  0x3f   :  { %309 = vmatpush.msra.mxu2 %v237_v44 }
  0x40   :  { %268 = vmatpush.msra.mxu1 %v221_v47  ;;  %v483_v47 = vld [vmem:[#allocation8 + $0x68] sm:$0xff] }
  0x41   :  { %269 = vmatmul.f32.vlgmr.msra.gmra.mxu1 %v1529_v7  ;;  %504 = vmatpush.msrb.mxu0 %v483_v47 }
  0x43   :  { %1121 = vmatmul.msk.f32.gmra.mxu0 %vm155_vm0, %v1545_v11 }
  0x49   :  { %272 = vmatmul.f32.gmra.mxu1 %v1526_v6 }
  0x4b   :  { %1122 = vmatmul.msk.f32.gmra.mxu0 %vm155_vm0, %v1549_v19 }
  0x51   :  { %275 = vmatmul.f32.gmra.mxu1 %v1523_v5 }
  0x53   :  { %1123 = vmatmul.msk.f32.gmra.mxu0 %vm155_vm0, %v1553_v28 }
  0x59   :  { %278 = vmatmul.f32.gmra.mxu1 %v1520_v4 }
  0x5b   :  { %1124 = vmatmul.msk.f32.gmra.mxu0 %vm155_vm0, %v1557_v37 }
  0x61   :  { %281 = vmatmul.f32.gmra.mxu1 %v1517_v3 }
  0x63   :  { %1125 = vmatmul.msk.f32.gmra.mxu0 %vm155_vm0, %v1561_v42 }
  0x69   :  { %284 = vmatmul.f32.gmra.mxu1 %v1514_v2 }
  0x71   :  { %287 = vmatmul.f32.gmra.mxu1 %v1511_v1 }
  0x79   :  { %290 = vmatmul.f32.gmra.mxu1 %v1509_v0 }
  0xa8   :  { %v197_v48 = vpop.f32.mrf.mxu0 }
  0xa9   :  { %310 = vmatmul.f32.vlgmr.msra.gmra.mxu2 %v197_v48 }
  0xb0   :  { %v200_v49 = vpop.f32.mrf.mxu0 }
  0xb1   :  { %313 = vmatmul.f32.gmra.mxu2 %v200_v49 }
  0xb8   :  { %v203_v50 = vpop.f32.mrf.mxu0 }
  0xb9   :  { %316 = vmatmul.f32.gmra.mxu2 %v203_v50 }
  0xbe   :  { %v270_v56 = vpop.f32.mrf.mxu1 }
  0xc0   :  { %v206_v51 = vpop.f32.mrf.mxu0 }
  0xc1   :  { %319 = vmatmul.f32.gmra.mxu2 %v206_v51  ;;  %v482_v51 = vld [vmem:[#allocation8 + $0x60] sm:$0xff] }
  0xc2   :  { %505 = vmatpush.msrb.mxu0 %v482_v51 }
  0xc6   :  { %v273_v57 = vpop.f32.mrf.mxu1 }
  0xc8   :  { %v209_v52 = vpop.f32.mrf.mxu0 }
  0xc9   :  { %322 = vmatmul.f32.gmra.mxu2 %v209_v52 }
  0xce   :  { %v276_v59 = vpop.f32.mrf.mxu1 }
  0xd0   :  { %v212_v53 = vpop.f32.mrf.mxu0 }
  0xd1   :  { %325 = vmatmul.f32.gmra.mxu2 %v212_v53 }
  0xd6   :  { %v279_v61 = vpop.f32.mrf.mxu1 }
  0xd8   :  { %v215_v54 = vpop.f32.mrf.mxu0 }
  0xd9   :  { %328 = vmatmul.f32.gmra.mxu2 %v215_v54 }
  0xde   :  { %v282_v1 = vpop.f32.mrf.mxu1 }
  0xe0   :  { %v218_v55 = vpop.f32.mrf.mxu0 }
  0xe1   :  { %331 = vmatmul.f32.gmra.mxu2 %v218_v55  ;;  %v481_v55 = vld [vmem:[#allocation8 + $0x58] sm:$0xff] }
  0xe2   :  { %506 = vmatpush.msrb.mxu0 %v481_v55 }
  0xe6   :  { %v285_v3 = vpop.f32.mrf.mxu1 }
  0xee   :  { %v288_v5 = vpop.f32.mrf.mxu1 }
  0xf6   :  { %v291_v24 = vpop.f32.mrf.mxu1 }
 0x12c   :  { %v311_v58 = vpop.f32.mrf.mxu2 }
 0x12d   :  { %v312_v6 = vadd.f32 %v311_v58, %v270_v56 }
 0x134   :  { %v314_v60 = vpop.f32.mrf.mxu2 }
 0x135   :  { %v315_v4 = vadd.f32 %v314_v60, %v273_v57 }
 0x137   :  { %v335_v13 = vadd.f32 %v315_v4, %v312_v6 }
 0x13c   :  { %v317_v62 = vpop.f32.mrf.mxu2 }
 0x13d   :  { %v318_v7 = vadd.f32 %v317_v62, %v276_v59  ;;  %v480_v59 = vld [vmem:[#allocation8 + $0x50] sm:$0xff] }
 0x13e   :  { %507 = vmatpush.msrb.mxu0 %v480_v59 }
 0x13f   :  { %v336_v16 = vadd.f32 %v335_v13, %v318_v7 }
 0x144   :  { %v320_v63 = vpop.f32.mrf.mxu2 }
 0x145   :  { %v321_v14 = vadd.f32 %v320_v63, %v279_v61  ;;  %v479_v63 = vld [vmem:[#allocation8 + $0x48] sm:$0xff] }
 0x146   :  { %508 = vmatpush.msrb.mxu0 %v479_v63 }
 0x147   :  { %v337_v20 = vadd.f32 %v336_v16, %v321_v14 }
 0x14c   :  { %v323_v2 = vpop.f32.mrf.mxu2 }
 0x14d   :  { %v324_v17 = vadd.f32 %v323_v2, %v282_v1 }
 0x14f   :  { %v338_v22 = vadd.f32 %v337_v20, %v324_v17  ;;  %v474_v20 = vld [vmem:[#allocation8 + $0x20] sm:$0xff] }
 0x154   :  { %v326_v0 = vpop.f32.mrf.mxu2 }
 0x155   :  { %v327_v21 = vadd.f32 %v326_v0, %v285_v3  ;;  %v478_v0 = vld [vmem:[#allocation8 + $0x40] sm:$0xff] }
 0x156   :  { %509 = vmatpush.msrb.mxu0 %v478_v0 }
 0x157   :  { %v339_v26 = vadd.f32 %v338_v22, %v327_v21  ;;  %v473_v22 = vld [vmem:[#allocation8 + $0x18] sm:$0xff] }
 0x15c   :  { %v329_v15 = vpop.f32.mrf.mxu2 }
 0x15d   :  { %v330_v23 = vadd.f32 %v329_v15, %v288_v5 }
 0x15f   :  { %v340_v29 = vadd.f32 %v339_v26, %v330_v23 }
 0x164   :  { %v332_v27 = vpop.f32.mrf.mxu2 }
 0x165   :  { %v333_v30 = vadd.f32 %v332_v27, %v291_v24  ;;  %v472_v24 = vld [vmem:[#allocation8 + $0x10] sm:$0xff]  ;;  %v470_v27 = vld [vmem:[#allocation8] sm:$0xff] }
 0x167   :  { %v341_v32 = vadd.f32 %v340_v29, %v333_v30 }
 0x169   :  { %v342_v33 = vrot.slane %v341_v32, 4 }
 0x16b   :  { %v343_v35 = vadd.f32 %v342_v33, %v341_v32 }
 0x16d   :  { %v344_v36 = vrot.slane %v343_v35, 2 }
 0x16f   :  { %v345_v39 = vadd.f32 %v344_v36, %v343_v35 }
 0x171   :  { %v346_v40 = vrot.slane %v345_v39, 1 }
 0x173   :  { %v347_v44 = vadd.f32 %v346_v40, %v345_v39 }
 0x175   :  { %v355_v46 = vmul.f32 %v1573_v41, %v347_v44 }
 0x177   :  { %v1576_v48 = vsub.f32 %v312_v6, %v355_v46  ;;  %v1578_v49 = vsub.f32 %v315_v4, %v355_v46  ;;  %v1580_v50 = vsub.f32 %v318_v7, %v355_v46  ;;  %v1582_v52 = vsub.f32 %v321_v14, %v355_v46  ;;  %v477_v7 = vld [vmem:[#allocation8 + $0x38] sm:$0xff]  ;;  %v476_v14 = vld [vmem:[#allocation8 + $0x30] sm:$0xff] }
 0x178   :  { %v1588_v56 = vsub.f32 %v324_v17, %v355_v46  ;;  %v361_v60 = vsub.f32 %v327_v21, %v355_v46  ;;  %v362_v1 = vsub.f32 %v330_v23, %v355_v46  ;;  %v363_v4 = vsub.f32 %v333_v30, %v355_v46  ;;  %510 = vmatpush.msrb.mxu0 %v477_v7  ;;  %v475_v17 = vld [vmem:[#allocation8 + $0x28] sm:$0xff]  ;;  %v1193_v46 = vld [vmem:[%s1737_s4] ss:$0 sm:$0xff] }
 0x179   :  { %v364_v53 = vmul.f32 %v1576_v48, %v1576_v48  ;;  %v365_v54 = vmul.f32 %v1578_v49, %v1578_v49  ;;  %v366_v57 = vmul.f32 %v1580_v50, %v1580_v50  ;;  %v367_v61 = vmul.f32 %v1582_v52, %v1582_v52 }
 0x17a   :  { %v368_v2 = vmul.f32 %v1588_v56, %v1588_v56  ;;  %v369_v5 = vmul.f32 %v361_v60, %v361_v60  ;;  %v370_v12 = vmul.f32 %v362_v1, %v362_v1  ;;  %v371_v15 = vmul.f32 %v363_v4, %v363_v4  ;;  %511 = vmatpush.msrb.mxu0 %v476_v14  ;;  %v497_v14 = vld [vmem:[#allocation8 + $0xd8] sm:$0xff] }
 0x17b   :  { %v372_v58 = vadd.f32 %v365_v54, %v364_v53 }
 0x17c   :  { %512 = vmatpush.msrb.mxu0 %v475_v17  ;;  %v494_v17 = vld [vmem:[#allocation8 + $0xc0] sm:$0xff] }
 0x17d   :  { %v373_v62 = vadd.f32 %v372_v58, %v366_v57 }
 0x17e   :  { %513 = vmatpush.msrb.mxu0 %v474_v20  ;;  %v492_v20 = vld [vmem:[#allocation8 + $0xb0] sm:$0xff] }
 0x17f   :  { %v374_v3 = vadd.f32 %v373_v62, %v367_v61 }
 0x180   :  { %514 = vmatpush.msrb.mxu0 %v473_v22  ;;  %v490_v22 = vld [vmem:[#allocation8 + $0xa0] sm:$0xff] }
 0x181   :  { %v375_v6 = vadd.f32 %v374_v3, %v368_v2 }
 0x182   :  { %515 = vmatpush.msrb.mxu0 %v472_v24  ;;  %v488_v24 = vld [vmem:[#allocation8 + $0x90] sm:$0xff] }
 0x183   :  { %v376_v13 = vadd.f32 %v375_v6, %v369_v5 }
 0x184   :  { %516 = vmatpush.msrb.mxu0 %v471_v25  ;;  %v487_v25 = vld [vmem:[#allocation8 + $0x88] sm:$0xff] }
 0x185   :  { %v377_v16 = vadd.f32 %v376_v13, %v370_v12  ;;  %v499_v12 = vld [vmem:[#allocation8 + $0xe8] sm:$0xff]  ;;  %v498_v13 = vld [vmem:[#allocation8 + $0xe0] sm:$0xff] }
 0x186   :  { %517 = vmatpush.msrb.mxu0 %v470_v27 }
 0x187   :  { %v378_v18 = vadd.f32 %v377_v16, %v371_v15  ;;  %v496_v15 = vld [vmem:[#allocation8 + $0xd0] sm:$0xff]  ;;  %v495_v16 = vld [vmem:[#allocation8 + $0xc8] sm:$0xff] }
 0x189   :  { %v379_v21 = vrot.slane %v378_v18, 4 }
 0x18b   :  { %v380_v23 = vadd.f32 %v379_v21, %v378_v18  ;;  %v493_v18 = vld [vmem:[#allocation8 + $0xb8] sm:$0xff]  ;;  %v491_v21 = vld [vmem:[#allocation8 + $0xa8] sm:$0xff] }
 0x18d   :  { %v381_v26 = vrot.slane %v380_v23, 2 }
 0x18f   :  { %v382_v29 = vadd.f32 %v381_v26, %v380_v23  ;;  %v489_v23 = vld [vmem:[#allocation8 + $0x98] sm:$0xff]  ;;  %v486_v26 = vld [vmem:[#allocation8 + $0x80] sm:$0xff] }
 0x191   :  { %v383_v30 = vrot.slane %v382_v29, 1 }
 0x193   :  { %v384_v31 = vadd.f32 %v383_v30, %v382_v29 }
 0x195   :  { %v385_v32 = vmul.f32 %v384_v31, %v1573_v41 }
 0x197   :  { %v386_v33 = vadd.f32 1e-05, %v385_v32 }
 0x199   :  { %1201 = vrsqrt.f32 %v386_v33  ;;  %vm393_vm3 = vweird.f32 %v386_v33 }
 0x19f   :  { %v1202_v34 = vpop.eup %1201 }
 0x1a0   :  { %v388_v35 = vmul.f32 %v1202_v34, %v386_v33  ;;  %vm394_vm2 = vweird.f32 %v1202_v34 }
 0x1a1   :  { %vm395_vm4 = vmor %vm393_vm3, %vm394_vm2 }
 0x1a2   :  { %v389_v36 = vmul.f32 %v1202_v34, %v388_v35 }
 0x1a4   :  { %v390_v38 = vmul.f32 0.5, %v389_v36 }
 0x1a6   :  { %v391_v39 = vsub.f32 1.5, %v390_v38 }
 0x1a8   :  { %v392_v40 = vmul.f32 %v1202_v34, %v391_v39 }
 0x1aa   :  { %v396_v44 = vsel %vm395_vm4, %v1202_v34, %v392_v40 }
 0x1ab   :  { %v404_v45 = vmul.f32 %v396_v44, %v363_v4  ;;  %v397_v47 = vmul.f32 %v396_v44, %v1576_v48  ;;  %v403_v51 = vmul.f32 %v396_v44, %v362_v1  ;;  %v402_v53 = vmul.f32 %v396_v44, %v361_v60 }
 0x1ac   :  { %v401_v58 = vmul.f32 %v396_v44, %v1588_v56  ;;  %v400_v59 = vmul.f32 %v396_v44, %v1582_v52  ;;  %v398_v2 = vmul.f32 %v396_v44, %v1578_v49  ;;  %v399_v48 = vmul.f32 %v396_v44, %v1580_v50  ;;  %v501_v49 = vld [vmem:[#allocation8 + $0xf8] sm:$0xff]  ;;  %v500_v50 = vld [vmem:[#allocation8 + $0xf0] sm:$0xff] }
 0x1ad   :  { %v416_v54 = vmul.f32 %v1192_v43, %v404_v45  ;;  %v409_v55 = vmul.f32 %v1192_v43, %v397_v47  ;;  %v415_v57 = vmul.f32 %v1192_v43, %v403_v51  ;;  %v414_v63 = vmul.f32 %v1192_v43, %v402_v53 }
 0x1ae   :  { %v413_v0 = vmul.f32 %v1192_v43, %v401_v58  ;;  %v412_v1 = vmul.f32 %v1192_v43, %v400_v59  ;;  %v410_v4 = vmul.f32 %v1192_v43, %v398_v2  ;;  %v411_v56 = vmul.f32 %v1192_v43, %v399_v48 }
 0x1af   :  { %v428_v61 = vadd.f32 %v1193_v46, %v416_v54  ;;  %v421_v62 = vadd.f32 %v1193_v46, %v409_v55  ;;  %v427_v3 = vadd.f32 %v1193_v46, %v415_v57  ;;  %v426_v60 = vadd.f32 %v1193_v46, %v414_v63 }
 0x1b0   :  { %v425_v5 = vadd.f32 %v1193_v46, %v413_v0  ;;  %v424_v52 = vadd.f32 %v1193_v46, %v412_v1  ;;  %v422_v6 = vadd.f32 %v1193_v46, %v410_v4  ;;  %v423_v7 = vadd.f32 %v1193_v46, %v411_v56 }
 0x1b1   :  { %437 = vmatpush.msra.mxu3 %v428_v61  ;;  %518 = vmatmul.f32.vlgmr.msrb.gmra.mxu0 %v421_v62 }
 0x1b3   :  { %438 = vmatpush.msra.mxu3 %v427_v3 }
 0x1b5   :  { %439 = vmatpush.msra.mxu3 %v426_v60 }
 0x1b7   :  { %440 = vmatpush.msra.mxu3 %v425_v5 }
 0x1b9   :  { %441 = vmatpush.msra.mxu3 %v424_v52  ;;  %521 = vmatmul.f32.gmra.mxu0 %v422_v6 }
 0x1bb   :  { %442 = vmatpush.msra.mxu3 %v423_v7 }
 0x1bd   :  { %443 = vmatpush.msra.mxu3 %v422_v6 }
 0x1bf   :  { %444 = vmatpush.msra.mxu3 %v421_v62 }
 0x1c0   :  { %1126 = vmatmul.msk.f32.vlgmr.msra.gmra.mxu3 %vm155_vm0, %v1532_v8 }
 0x1c1   :  { %524 = vmatmul.f32.gmra.mxu0 %v423_v7  ;;  %543 = vmatpush.msrb.mxu3 %v501_v49 }
 0x1c3   :  { %544 = vmatpush.msrb.mxu3 %v500_v50 }
 0x1c5   :  { %545 = vmatpush.msrb.mxu3 %v499_v12 }
 0x1c7   :  { %546 = vmatpush.msrb.mxu3 %v498_v13 }
 0x1c8   :  { %1127 = vmatmul.msk.f32.gmra.mxu3 %vm155_vm0, %v1537_v9 }
 0x1c9   :  { %527 = vmatmul.f32.gmra.mxu0 %v424_v52  ;;  %547 = vmatpush.msrb.mxu3 %v497_v14 }
 0x1cb   :  { %548 = vmatpush.msrb.mxu3 %v496_v15 }
 0x1cd   :  { %549 = vmatpush.msrb.mxu3 %v495_v16  ;;  %v735_v16 = vld [vmem:[#allocation10 + $0x78] sm:$0xff] }
 0x1ce   :  { %752 = vmatpush.msrb.mxu2 %v735_v16 }
 0x1cf   :  { %550 = vmatpush.msrb.mxu3 %v494_v17 }
 0x1d0   :  { %1128 = vmatmul.msk.f32.gmra.mxu3 %vm155_vm0, %v1541_v10 }
 0x1d1   :  { %530 = vmatmul.f32.gmra.mxu0 %v425_v5  ;;  %551 = vmatpush.msrb.mxu3 %v493_v18  ;;  %v734_v18 = vld [vmem:[#allocation10 + $0x70] sm:$0xff] }
 0x1d2   :  { %753 = vmatpush.msrb.mxu2 %v734_v18  ;;  %v1195_v18 = vld [vmem:[%s1740_s7] ss:$0 sm:$0xff] }
 0x1d3   :  { %552 = vmatpush.msrb.mxu3 %v492_v20 }
 0x1d5   :  { %553 = vmatpush.msrb.mxu3 %v491_v21 }
 0x1d7   :  { %554 = vmatpush.msrb.mxu3 %v490_v22 }
 0x1d8   :  { %1129 = vmatmul.msk.f32.gmra.mxu3 %vm155_vm0, %v1545_v11 }
 0x1d9   :  { %533 = vmatmul.f32.gmra.mxu0 %v426_v60  ;;  %555 = vmatpush.msrb.mxu3 %v489_v23  ;;  %v733_v23 = vld [vmem:[#allocation10 + $0x68] sm:$0xff] }
 0x1da   :  { %754 = vmatpush.msrb.mxu2 %v733_v23 }
 0x1db   :  { %556 = vmatpush.msrb.mxu3 %v488_v24 }
 0x1dd   :  { %557 = vmatpush.msrb.mxu3 %v487_v25 }
 0x1df   :  { %558 = vmatpush.msrb.mxu3 %v486_v26 }
 0x1e0   :  { %1130 = vmatmul.msk.f32.gmra.mxu3 %vm155_vm0, %v1549_v19 }
 0x1e1   :  { %536 = vmatmul.f32.gmra.mxu0 %v427_v3 }
 0x1e8   :  { %1131 = vmatmul.msk.f32.gmra.mxu3 %vm155_vm0, %v1553_v28 }
 0x1e9   :  { %539 = vmatmul.f32.gmra.mxu0 %v428_v61 }
 0x1f0   :  { %1132 = vmatmul.msk.f32.gmra.mxu3 %vm155_vm0, %v1557_v37 }
 0x1f8   :  { %1133 = vmatmul.msk.f32.gmra.mxu3 %vm155_vm0, %v1561_v42 }
 0x22e   :  { %v519_v36 = vpop.f32.mrf.mxu0 }
 0x236   :  { %v522_v38 = vpop.f32.mrf.mxu0 }
 0x23e   :  { %v525_v40 = vpop.f32.mrf.mxu0 }
 0x243   :  { %v446_v27 = vpop.f32.mrf.mxu3 }
 0x244   :  { %559 = vmatmul.f32.vlgmr.msrb.gmra.mxu3 %v446_v27  ;;  %v732_v27 = vld [vmem:[#allocation10 + $0x60] sm:$0xff] }
 0x245   :  { %755 = vmatpush.msrb.mxu2 %v732_v27 }
 0x246   :  { %v528_v44 = vpop.f32.mrf.mxu0 }
 0x24b   :  { %v449_v29 = vpop.f32.mrf.mxu3 }
 0x24c   :  { %562 = vmatmul.f32.gmra.mxu3 %v449_v29 }
 0x24e   :  { %v531_v47 = vpop.f32.mrf.mxu0 }
 0x253   :  { %v452_v30 = vpop.f32.mrf.mxu3 }
 0x254   :  { %565 = vmatmul.f32.gmra.mxu3 %v452_v30 }
 0x256   :  { %v534_v53 = vpop.f32.mrf.mxu0 }
 0x25b   :  { %v455_v31 = vpop.f32.mrf.mxu3 }
 0x25c   :  { %568 = vmatmul.f32.gmra.mxu3 %v455_v31 }
 0x25e   :  { %v537_v59 = vpop.f32.mrf.mxu0 }
 0x263   :  { %v458_v32 = vpop.f32.mrf.mxu3 }
 0x264   :  { %571 = vmatmul.f32.gmra.mxu3 %v458_v32  ;;  %v731_v32 = vld [vmem:[#allocation10 + $0x58] sm:$0xff] }
 0x265   :  { %756 = vmatpush.msrb.mxu2 %v731_v32 }
 0x266   :  { %v540_v5 = vpop.f32.mrf.mxu0 }
 0x26b   :  { %v461_v33 = vpop.f32.mrf.mxu3 }
 0x26c   :  { %574 = vmatmul.f32.gmra.mxu3 %v461_v33 }
 0x273   :  { %v464_v34 = vpop.f32.mrf.mxu3 }
 0x274   :  { %577 = vmatmul.f32.gmra.mxu3 %v464_v34 }
 0x27b   :  { %v467_v35 = vpop.f32.mrf.mxu3 }
 0x27c   :  { %580 = vmatmul.f32.gmra.mxu3 %v467_v35 }
 0x2c7   :  { %v560_v39 = vpop.f32.mrf.mxu3 }
 0x2c8   :  { %v561_v57 = vadd.f32 %v560_v39, %v519_v36  ;;  %v730_v36 = vld [vmem:[#allocation10 + $0x50] sm:$0xff] }
 0x2c9   :  { %757 = vmatpush.msrb.mxu2 %v730_v36 }
 0x2cf   :  { %v563_v43 = vpop.f32.mrf.mxu3 }
 0x2d0   :  { %v564_v55 = vadd.f32 %v563_v43, %v522_v38  ;;  %v729_v43 = vld [vmem:[#allocation10 + $0x48] sm:$0xff] }
 0x2d1   :  { %758 = vmatpush.msrb.mxu2 %v729_v43 }
 0x2d2   :  { %v584_v61 = vadd.f32 %v564_v55, %v561_v57 }
 0x2d7   :  { %v566_v45 = vpop.f32.mrf.mxu3 }
 0x2d8   :  { %v567_v58 = vadd.f32 %v566_v45, %v525_v40 }
 0x2da   :  { %v585_v2 = vadd.f32 %v584_v61, %v567_v58  ;;  %v725_v61 = vld [vmem:[#allocation10 + $0x28] sm:$0xff] }
 0x2df   :  { %v569_v46 = vpop.f32.mrf.mxu3 }
 0x2e0   :  { %v570_v62 = vadd.f32 %v569_v46, %v528_v44 }
 0x2e2   :  { %v586_v0 = vadd.f32 %v585_v2, %v570_v62 }
 0x2e7   :  { %v572_v51 = vpop.f32.mrf.mxu3 }
 0x2e8   :  { %v573_v3 = vadd.f32 %v572_v51, %v531_v47  ;;  %v728_v47 = vld [vmem:[#allocation10 + $0x40] sm:$0xff] }
 0x2e9   :  { %759 = vmatpush.msrb.mxu2 %v728_v47 }
 0x2ea   :  { %v587_v60 = vadd.f32 %v586_v0, %v573_v3  ;;  %v722_v0 = vld [vmem:[#allocation10 + $0x10] sm:$0xff] }
 0x2ef   :  { %v575_v54 = vpop.f32.mrf.mxu3 }
 0x2f0   :  { %v576_v48 = vadd.f32 %v575_v54, %v534_v53  ;;  %v727_v54 = vld [vmem:[#allocation10 + $0x38] sm:$0xff] }
 0x2f1   :  { %760 = vmatpush.msrb.mxu2 %v727_v54 }
 0x2f2   :  { %v588_v4 = vadd.f32 %v587_v60, %v576_v48  ;;  %v721_v60 = vld [vmem:[#allocation10 + $0x8] sm:$0xff] }
 0x2f7   :  { %v578_v63 = vpop.f32.mrf.mxu3 }
 0x2f8   :  { %v579_v1 = vadd.f32 %v578_v63, %v537_v59  ;;  %v724_v63 = vld [vmem:[#allocation10 + $0x20] sm:$0xff] }
 0x2fa   :  { %v589_v52 = vadd.f32 %v588_v4, %v579_v1  ;;  %v720_v4 = vld [vmem:[#allocation10] sm:$0xff] }
 0x2ff   :  { %v581_v56 = vpop.f32.mrf.mxu3 }
 0x300   :  { %v582_v6 = vadd.f32 %v581_v56, %v540_v5 }
 0x302   :  { %v590_v7 = vadd.f32 %v589_v52, %v582_v6 }
 0x304   :  { %v591_v49 = vrot.slane %v590_v7, 4 }
 0x306   :  { %v592_v50 = vadd.f32 %v591_v49, %v590_v7 }
 0x308   :  { %v593_v12 = vrot.slane %v592_v50, 2 }
 0x30a   :  { %v594_v13 = vadd.f32 %v593_v12, %v592_v50 }
 0x30c   :  { %v595_v14 = vrot.slane %v594_v13, 1 }
 0x30e   :  { %v596_v15 = vadd.f32 %v595_v14, %v594_v13 }
 0x310   :  { %v597_v17 = vmul.f32 %v596_v15, %v1573_v41  ;;  %v1194_v15 = vld [vmem:[%s1739_s6] ss:$0 sm:$0xff] }
 0x312   :  { %v1625_v20 = vsub.f32 %v561_v57, %v597_v17  ;;  %v1627_v21 = vsub.f32 %v564_v55, %v597_v17  ;;  %v1629_v22 = vsub.f32 %v567_v58, %v597_v17  ;;  %v1631_v24 = vsub.f32 %v570_v62, %v597_v17  ;;  %v726_v58 = vld [vmem:[#allocation10 + $0x30] sm:$0xff] }
 0x313   :  { %v1637_v29 = vsub.f32 %v573_v3, %v597_v17  ;;  %v603_v33 = vsub.f32 %v576_v48, %v597_v17  ;;  %v604_v38 = vsub.f32 %v579_v1, %v597_v17  ;;  %v605_v44 = vsub.f32 %v582_v6, %v597_v17  ;;  %761 = vmatpush.msrb.mxu2 %v726_v58  ;;  %v723_v3 = vld [vmem:[#allocation10 + $0x18] sm:$0xff] }
 0x314   :  { %v606_v25 = vmul.f32 %v1625_v20, %v1625_v20  ;;  %v607_v26 = vmul.f32 %v1627_v21, %v1627_v21  ;;  %v608_v30 = vmul.f32 %v1629_v22, %v1629_v22  ;;  %v609_v34 = vmul.f32 %v1631_v24, %v1631_v24 }
 0x315   :  { %v610_v39 = vmul.f32 %v1637_v29, %v1637_v29  ;;  %v611_v45 = vmul.f32 %v603_v33, %v603_v33  ;;  %v612_v51 = vmul.f32 %v604_v38, %v604_v38  ;;  %v613_v55 = vmul.f32 %v605_v44, %v605_v44  ;;  %762 = vmatpush.msrb.mxu2 %v725_v61  ;;  %v751_v61 = vld [vmem:[#allocation10 + $0xf8] sm:$0xff] }
 0x316   :  { %v614_v31 = vadd.f32 %v607_v26, %v606_v25  ;;  %793 = vmatpush.msra.mxu0 %v751_v61  ;;  %v984_v61 = vld [vmem:[#allocation11 + $0x70] sm:$0xff] }
 0x317   :  { %763 = vmatpush.msrb.mxu2 %v724_v63  ;;  %v749_v63 = vld [vmem:[#allocation10 + $0xe8] sm:$0xff] }
 0x318   :  { %v615_v35 = vadd.f32 %v614_v31, %v608_v30 }
 0x319   :  { %764 = vmatpush.msrb.mxu2 %v723_v3  ;;  %v744_v3 = vld [vmem:[#allocation10 + $0xc0] sm:$0xff] }
 0x31a   :  { %v616_v40 = vadd.f32 %v615_v35, %v609_v34 }
 0x31b   :  { %765 = vmatpush.msrb.mxu2 %v722_v0  ;;  %v742_v0 = vld [vmem:[#allocation10 + $0xb0] sm:$0xff] }
 0x31c   :  { %v617_v46 = vadd.f32 %v616_v40, %v610_v39 }
 0x31d   :  { %766 = vmatpush.msrb.mxu2 %v721_v60  ;;  %v739_v60 = vld [vmem:[#allocation10 + $0x98] sm:$0xff] }
 0x31e   :  { %v618_v53 = vadd.f32 %v617_v46, %v611_v45 }
 0x31f   :  { %767 = vmatpush.msrb.mxu2 %v720_v4  ;;  %v737_v4 = vld [vmem:[#allocation10 + $0x88] sm:$0xff] }
 0x320   :  { %v619_v57 = vadd.f32 %v618_v53, %v612_v51 }
 0x322   :  { %v620_v59 = vadd.f32 %v619_v57, %v613_v55 }
 0x324   :  { %v621_v62 = vrot.slane %v620_v59, 4 }
 0x326   :  { %v622_v2 = vadd.f32 %v621_v62, %v620_v59  ;;  %v750_v62 = vld [vmem:[#allocation10 + $0xf0] sm:$0xff] }
 0x327   :  { %794 = vmatpush.msra.mxu0 %v750_v62 }
 0x328   :  { %v623_v48 = vrot.slane %v622_v2, 2 }
 0x329   :  { %795 = vmatpush.msra.mxu0 %v749_v63 }
 0x32a   :  { %v624_v1 = vadd.f32 %v623_v48, %v622_v2  ;;  %v748_v2 = vld [vmem:[#allocation10 + $0xe0] sm:$0xff]  ;;  %v741_v48 = vld [vmem:[#allocation10 + $0xa8] sm:$0xff] }
 0x32b   :  { %796 = vmatpush.msra.mxu0 %v748_v2 }
 0x32c   :  { %v625_v5 = vrot.slane %v624_v1, 1 }
 0x32e   :  { %v626_v56 = vadd.f32 %v625_v5, %v624_v1  ;;  %v738_v1 = vld [vmem:[#allocation10 + $0x90] sm:$0xff] }
 0x330   :  { %v627_v52 = vmul.f32 %v626_v56, %v1573_v41 }
 0x332   :  { %v628_v6 = vadd.f32 1e-05, %v627_v52 }
 0x334   :  { %1203 = vrsqrt.f32 %v628_v6  ;;  %vm635_vm6 = vweird.f32 %v628_v6 }
 0x33a   :  { %v1204_v7 = vpop.eup %1203 }
 0x33b   :  { %v630_v49 = vmul.f32 %v1204_v7, %v628_v6  ;;  %vm636_vm5 = vweird.f32 %v1204_v7 }
 0x33c   :  { %vm637_vm7 = vmor %vm635_vm6, %vm636_vm5 }
 0x33d   :  { %v631_v50 = vmul.f32 %v1204_v7, %v630_v49 }
 0x33f   :  { %v632_v12 = vmul.f32 0.5, %v631_v50 }
 0x341   :  { %v633_v13 = vsub.f32 1.5, %v632_v12 }
 0x343   :  { %v634_v14 = vmul.f32 %v1204_v7, %v633_v13 }
 0x345   :  { %v638_v16 = vsel %vm637_vm7, %v1204_v7, %v634_v14 }
 0x346   :  { %v646_v17 = vmul.f32 %v638_v16, %v605_v44  ;;  %v639_v23 = vmul.f32 %v638_v16, %v1625_v20  ;;  %v645_v25 = vmul.f32 %v638_v16, %v604_v38  ;;  %v644_v26 = vmul.f32 %v638_v16, %v603_v33 }
 0x347   :  { %v643_v27 = vmul.f32 %v638_v16, %v1637_v29  ;;  %v642_v30 = vmul.f32 %v638_v16, %v1631_v24  ;;  %v640_v31 = vmul.f32 %v638_v16, %v1627_v21  ;;  %v641_v39 = vmul.f32 %v638_v16, %v1629_v22 }
 0x348   :  { %v658_v32 = vmul.f32 %v1194_v15, %v646_v17  ;;  %v651_v34 = vmul.f32 %v1194_v15, %v639_v23  ;;  %v657_v35 = vmul.f32 %v1194_v15, %v645_v25  ;;  %v656_v36 = vmul.f32 %v1194_v15, %v644_v26 }
 0x349   :  { %v655_v45 = vmul.f32 %v1194_v15, %v643_v27  ;;  %v654_v46 = vmul.f32 %v1194_v15, %v642_v30  ;;  %v652_v47 = vmul.f32 %v1194_v15, %v640_v31  ;;  %v653_v21 = vmul.f32 %v1194_v15, %v641_v39 }
 0x34a   :  { %v670_v40 = vadd.f32 %v1195_v18, %v658_v32  ;;  %v663_v43 = vadd.f32 %v1195_v18, %v651_v34  ;;  %v669_v44 = vadd.f32 %v1195_v18, %v657_v35  ;;  %v668_v33 = vadd.f32 %v1195_v18, %v656_v36 }
 0x34b   :  { %v667_v29 = vadd.f32 %v1195_v18, %v655_v45  ;;  %v666_v53 = vadd.f32 %v1195_v18, %v654_v46  ;;  %v664_v54 = vadd.f32 %v1195_v18, %v652_v47  ;;  %v665_v55 = vadd.f32 %v1195_v18, %v653_v21 }
 0x34c   :  { %v678_v20 = vmax.f32 %v670_v40, 0.0  ;;  %v671_v38 = vmax.f32 %v663_v43, 0.0  ;;  %v677_v24 = vmax.f32 %v669_v44, 0.0  ;;  %v676_v51 = vmax.f32 %v668_v33, 0.0 }
 0x34d   :  { %v675_v22 = vmax.f32 %v667_v29, 0.0  ;;  %v674_v57 = vmax.f32 %v666_v53, 0.0  ;;  %v672_v58 = vmax.f32 %v664_v54, 0.0  ;;  %v673_v59 = vmax.f32 %v665_v55, 0.0 }
 0x34e   :  { %687 = vmatpush.msrb.mxu1 %v678_v20  ;;  %768 = vmatmul.f32.vlgmr.msrb.gmra.mxu2 %v671_v38 }
 0x350   :  { %688 = vmatpush.msrb.mxu1 %v677_v24 }
 0x352   :  { %689 = vmatpush.msrb.mxu1 %v676_v51 }
 0x354   :  { %690 = vmatpush.msrb.mxu1 %v675_v22 }
 0x356   :  { %691 = vmatpush.msrb.mxu1 %v674_v57  ;;  %771 = vmatmul.f32.gmra.mxu2 %v672_v58 }
 0x358   :  { %692 = vmatpush.msrb.mxu1 %v673_v59 }
 0x35a   :  { %693 = vmatpush.msrb.mxu1 %v672_v58  ;;  %v985_v58 = vld [vmem:[#allocation11 + $0x78] sm:$0xff] }
 0x35c   :  { %694 = vmatpush.msrb.mxu1 %v671_v38 }
 0x35d   :  { %1134 = vmatmul.msk.f32.vlgmr.msrb.gmra.mxu1 %vm155_vm0, %v1532_v8  ;;  %v747_v8 = vld [vmem:[#allocation10 + $0xd8] sm:$0xff] }
 0x35e   :  { %774 = vmatmul.f32.gmra.mxu2 %v673_v59  ;;  %797 = vmatpush.msra.mxu0 %v747_v8  ;;  %v983_v8 = vld [vmem:[#allocation11 + $0x68] sm:$0xff] }
 0x35f   :  { %1150 = vmatpush.msra.mxu1 %v985_v58 }
 0x361   :  { %1151 = vmatpush.msra.mxu1 %v984_v61 }
 0x363   :  { %1152 = vmatpush.msra.mxu1 %v983_v8 }
 0x365   :  { %1135 = vmatmul.msk.f32.gmra.mxu1 %vm155_vm0, %v1537_v9  ;;  %v746_v9 = vld [vmem:[#allocation10 + $0xd0] sm:$0xff] }
 0x366   :  { %777 = vmatmul.f32.gmra.mxu2 %v674_v57  ;;  %798 = vmatpush.msra.mxu0 %v746_v9 }
 0x36d   :  { %1136 = vmatmul.msk.f32.gmra.mxu1 %vm155_vm0, %v1541_v10  ;;  %v745_v10 = vld [vmem:[#allocation10 + $0xc8] sm:$0xff] }
 0x36e   :  { %780 = vmatmul.f32.gmra.mxu2 %v675_v22  ;;  %799 = vmatpush.msra.mxu0 %v745_v10 }
 0x370   :  { %800 = vmatpush.msra.mxu0 %v744_v3 }
 0x375   :  { %1137 = vmatmul.msk.f32.gmra.mxu1 %vm155_vm0, %v1545_v11  ;;  %v743_v11 = vld [vmem:[#allocation10 + $0xb8] sm:$0xff] }
 0x376   :  { %783 = vmatmul.f32.gmra.mxu2 %v676_v51  ;;  %801 = vmatpush.msra.mxu0 %v743_v11  ;;  %v982_v11 = vld [vmem:[#allocation11 + $0x60] sm:$0xff] }
 0x377   :  { %1153 = vmatpush.msra.mxu1 %v982_v11 }
 0x378   :  { %802 = vmatpush.msra.mxu0 %v742_v0 }
 0x37a   :  { %803 = vmatpush.msra.mxu0 %v741_v48 }
 0x37d   :  { %1138 = vmatmul.msk.f32.gmra.mxu1 %vm155_vm0, %v1549_v19  ;;  %v740_v19 = vld [vmem:[#allocation10 + $0xa0] sm:$0xff] }
 0x37e   :  { %786 = vmatmul.f32.gmra.mxu2 %v677_v24  ;;  %804 = vmatpush.msra.mxu0 %v740_v19 }
 0x380   :  { %805 = vmatpush.msra.mxu0 %v739_v60  ;;  %v981_v60 = vld [vmem:[#allocation11 + $0x58] sm:$0xff] }
 0x381   :  { %1154 = vmatpush.msra.mxu1 %v981_v60 }
 0x382   :  { %806 = vmatpush.msra.mxu0 %v738_v1 }
 0x384   :  { %807 = vmatpush.msra.mxu0 %v737_v4 }
 0x385   :  { %1139 = vmatmul.msk.f32.gmra.mxu1 %vm155_vm0, %v1553_v28  ;;  %v736_v28 = vld [vmem:[#allocation10 + $0x80] sm:$0xff] }
 0x386   :  { %789 = vmatmul.f32.gmra.mxu2 %v678_v20  ;;  %808 = vmatpush.msra.mxu0 %v736_v28 }
 0x388   :  { %1006 = vmatpush.msrb.mxu0 %v985_v58 }
 0x38a   :  { %1007 = vmatpush.msrb.mxu0 %v984_v61 }
 0x38c   :  { %1008 = vmatpush.msrb.mxu0 %v983_v8 }
 0x38d   :  { %1140 = vmatmul.msk.f32.gmra.mxu1 %vm155_vm0, %v1557_v37 }
 0x38e   :  { %1009 = vmatpush.msrb.mxu0 %v982_v11 }
 0x390   :  { %1010 = vmatpush.msrb.mxu0 %v981_v60 }
 0x395   :  { %1141 = vmatmul.msk.f32.gmra.mxu1 %vm155_vm0, %v1561_v42 }
 0x3d1   :  { %v769_v50 = vpop.f32.mrf.mxu2 }
 0x3d9   :  { %v772_v12 = vpop.f32.mrf.mxu2 }
 0x3da   :  { %v696_v5 = vpop.f32.mrf.mxu1 }
 0x3db   :  { %809 = vmatmul.f32.vlgmr.msra.gmra.mxu0 %v696_v5  ;;  %v980_v5 = vld [vmem:[#allocation11 + $0x50] sm:$0xff] }
 0x3dc   :  { %1011 = vmatpush.msrb.mxu0 %v980_v5  ;;  %1155 = vmatpush.msra.mxu1 %v980_v5 }
 0x3e1   :  { %v775_v14 = vpop.f32.mrf.mxu2 }
 0x3e2   :  { %v699_v56 = vpop.f32.mrf.mxu1 }
 0x3e3   :  { %812 = vmatmul.f32.gmra.mxu0 %v699_v56 }
 0x3e9   :  { %v778_v16 = vpop.f32.mrf.mxu2 }
 0x3ea   :  { %v702_v52 = vpop.f32.mrf.mxu1 }
 0x3eb   :  { %815 = vmatmul.f32.gmra.mxu0 %v702_v52 }
 0x3f1   :  { %v781_v23 = vpop.f32.mrf.mxu2 }
 0x3f2   :  { %v705_v37 = vpop.f32.mrf.mxu1 }
 0x3f3   :  { %818 = vmatmul.f32.gmra.mxu0 %v705_v37 }
 0x3f9   :  { %v784_v26 = vpop.f32.mrf.mxu2 }
 0x3fa   :  { %v708_v6 = vpop.f32.mrf.mxu1 }
 0x3fb   :  { %821 = vmatmul.f32.gmra.mxu0 %v708_v6  ;;  %v979_v6 = vld [vmem:[#allocation11 + $0x48] sm:$0xff] }
 0x3fc   :  { %1012 = vmatpush.msrb.mxu0 %v979_v6  ;;  %1156 = vmatpush.msra.mxu1 %v979_v6 }
 0x401   :  { %v787_v34 = vpop.f32.mrf.mxu2 }
 0x402   :  { %v711_v42 = vpop.f32.mrf.mxu1 }
 0x403   :  { %824 = vmatmul.f32.gmra.mxu0 %v711_v42 }
 0x409   :  { %v790_v33 = vpop.f32.mrf.mxu2 }
 0x40a   :  { %v714_v7 = vpop.f32.mrf.mxu1 }
 0x40b   :  { %827 = vmatmul.f32.gmra.mxu0 %v714_v7 }
 0x412   :  { %v717_v49 = vpop.f32.mrf.mxu1 }
 0x413   :  { %830 = vmatmul.f32.gmra.mxu0 %v717_v49 }
 0x458   :  { %v810_v13 = vpop.f32.mrf.mxu0 }
 0x459   :  { %v811_v31 = vadd.f32 %v810_v13, %v769_v50  ;;  %v978_v50 = vld [vmem:[#allocation11 + $0x40] sm:$0xff] }
 0x45a   :  { %1013 = vmatpush.msrb.mxu0 %v978_v50  ;;  %1157 = vmatpush.msra.mxu1 %v978_v50  ;;  %v1208_v50 = vld [vmem:[#allocation2 + $0x8] sm:$0xff] }
 0x460   :  { %v813_v15 = vpop.f32.mrf.mxu0 }
 0x461   :  { %v814_v30 = vadd.f32 %v813_v15, %v772_v12 }
 0x463   :  { %v834_v35 = vadd.f32 %v814_v30, %v811_v31 }
 0x468   :  { %v816_v17 = vpop.f32.mrf.mxu0 }
 0x469   :  { %v817_v32 = vadd.f32 %v816_v17, %v775_v14  ;;  %v977_v14 = vld [vmem:[#allocation11 + $0x38] sm:$0xff]  ;;  %v976_v17 = vld [vmem:[#allocation11 + $0x30] sm:$0xff] }
 0x46a   :  { %1014 = vmatpush.msrb.mxu0 %v977_v14  ;;  %1158 = vmatpush.msra.mxu1 %v977_v14  ;;  %v1001_v14 = vld [vmem:[#allocation11 + $0xf8] sm:$0xff] }
 0x46b   :  { %v835_v40 = vadd.f32 %v834_v35, %v817_v32  ;;  %1047 = vmatpush.msra.mxu2 %v1001_v14 }
 0x46c   :  { %1015 = vmatpush.msrb.mxu0 %v976_v17  ;;  %1159 = vmatpush.msra.mxu1 %v976_v17  ;;  %v998_v17 = vld [vmem:[#allocation11 + $0xe0] sm:$0xff] }
 0x470   :  { %v819_v18 = vpop.f32.mrf.mxu0 }
 0x471   :  { %v820_v36 = vadd.f32 %v819_v18, %v778_v16 }
 0x473   :  { %v836_v44 = vadd.f32 %v835_v40, %v820_v36 }
 0x478   :  { %v822_v25 = vpop.f32.mrf.mxu0 }
 0x479   :  { %v823_v43 = vadd.f32 %v822_v25, %v781_v23  ;;  %v975_v23 = vld [vmem:[#allocation11 + $0x28] sm:$0xff] }
 0x47a   :  { %1016 = vmatpush.msrb.mxu0 %v975_v23  ;;  %1160 = vmatpush.msra.mxu1 %v975_v23  ;;  %v1211_v23 = vld [vmem:[#allocation2 + $0x20] sm:$0xff] }
 0x47b   :  { %v837_v46 = vadd.f32 %v836_v44, %v823_v43 }
 0x480   :  { %v825_v27 = vpop.f32.mrf.mxu0 }
 0x481   :  { %v826_v45 = vadd.f32 %v825_v27, %v784_v26  ;;  %v974_v26 = vld [vmem:[#allocation11 + $0x20] sm:$0xff] }
 0x482   :  { %1017 = vmatpush.msrb.mxu0 %v974_v26  ;;  %1161 = vmatpush.msra.mxu1 %v974_v26  ;;  %v1213_v26 = vld [vmem:[#allocation2 + $0x30] sm:$0xff] }
 0x483   :  { %v838_v38 = vadd.f32 %v837_v46, %v826_v45 }
 0x488   :  { %v828_v39 = vpop.f32.mrf.mxu0 }
 0x489   :  { %v829_v20 = vadd.f32 %v828_v39, %v787_v34  ;;  %v971_v34 = vld [vmem:[#allocation11 + $0x8] sm:$0xff] }
 0x48b   :  { %v839_v24 = vadd.f32 %v838_v38, %v829_v20 }
 0x490   :  { %v831_v47 = vpop.f32.mrf.mxu0 }
 0x491   :  { %v832_v29 = vadd.f32 %v831_v47, %v790_v33 }
 0x493   :  { %v840_v21 = vadd.f32 %v839_v24, %v832_v29  ;;  %v1196_v24 = vld [vmem:[%s1742_s9] ss:$0 sm:$0xff] }
 0x495   :  { %v841_v51 = vrot.slane %v840_v21, 4 }
 0x497   :  { %v842_v53 = vadd.f32 %v841_v51, %v840_v21 }
 0x499   :  { %v843_v54 = vrot.slane %v842_v53, 2 }
 0x49b   :  { %v844_v22 = vadd.f32 %v843_v54, %v842_v53 }
 0x49d   :  { %v845_v55 = vrot.slane %v844_v22, 1 }
 0x49f   :  { %v846_v57 = vadd.f32 %v845_v55, %v844_v22 }
 0x4a1   :  { %v847_v59 = vmul.f32 %v846_v57, %v1573_v41 }
 0x4a3   :  { %v1674_v62 = vsub.f32 %v811_v31, %v847_v59  ;;  %v1676_v63 = vsub.f32 %v814_v30, %v847_v59  ;;  %v1678_v2 = vsub.f32 %v817_v32, %v847_v59  ;;  %v1680_v9 = vsub.f32 %v820_v36, %v847_v59  ;;  %v973_v30 = vld [vmem:[#allocation11 + $0x18] sm:$0xff]  ;;  %v972_v32 = vld [vmem:[#allocation11 + $0x10] sm:$0xff]  ;;  %v970_v36 = vld [vmem:[#allocation11] sm:$0xff] }
 0x4a4   :  { %v1686_v0 = vsub.f32 %v823_v43, %v847_v59  ;;  %v1690_v1 = vsub.f32 %v826_v45, %v847_v59  ;;  %v1694_v56 = vsub.f32 %v829_v20, %v847_v59  ;;  %v855_v42 = vsub.f32 %v832_v29, %v847_v59  ;;  %1018 = vmatpush.msrb.mxu0 %v973_v30 }
 0x4a5   :  { %v856_v10 = vmul.f32 %v1674_v62, %v1674_v62  ;;  %v857_v3 = vmul.f32 %v1676_v63, %v1676_v63  ;;  %v858_v48 = vmul.f32 %v1678_v2, %v1678_v2  ;;  %v859_v4 = vmul.f32 %v1680_v9, %v1680_v9  ;;  %1162 = vmatpush.msra.mxu1 %v973_v30  ;;  %v996_v30 = vld [vmem:[#allocation11 + $0xd0] sm:$0xff] }
 0x4a6   :  { %v860_v52 = vmul.f32 %v1686_v0, %v1686_v0  ;;  %v861_v7 = vmul.f32 %v1690_v1, %v1690_v1  ;;  %v862_v12 = vmul.f32 %v1694_v56, %v1694_v56  ;;  %v863_v15 = vmul.f32 %v855_v42, %v855_v42  ;;  %1019 = vmatpush.msrb.mxu0 %v972_v32 }
 0x4a7   :  { %v864_v19 = vadd.f32 %v857_v3, %v856_v10  ;;  %1163 = vmatpush.msra.mxu1 %v972_v32  ;;  %v994_v32 = vld [vmem:[#allocation11 + $0xc0] sm:$0xff] }
 0x4a8   :  { %1020 = vmatpush.msrb.mxu0 %v971_v34 }
 0x4a9   :  { %v865_v28 = vadd.f32 %v864_v19, %v858_v48  ;;  %1164 = vmatpush.msra.mxu1 %v971_v34  ;;  %v993_v34 = vld [vmem:[#allocation11 + $0xb8] sm:$0xff] }
 0x4aa   :  { %1021 = vmatpush.msrb.mxu0 %v970_v36 }
 0x4ab   :  { %v866_v37 = vadd.f32 %v865_v28, %v859_v4  ;;  %1165 = vmatpush.msra.mxu1 %v970_v36  ;;  %v991_v36 = vld [vmem:[#allocation11 + $0xa8] sm:$0xff] }
 0x4ad   :  { %v867_v49 = vadd.f32 %v866_v37, %v860_v52 }
 0x4af   :  { %v868_v13 = vadd.f32 %v867_v49, %v861_v7  ;;  %v1207_v49 = vld [vmem:[#allocation2] sm:$0xff] }
 0x4b1   :  { %v869_v16 = vadd.f32 %v868_v13, %v862_v12  ;;  %v1209_v12 = vld [vmem:[#allocation2 + $0x10] sm:$0xff]  ;;  %v1210_v13 = vld [vmem:[#allocation2 + $0x18] sm:$0xff] }
 0x4b3   :  { %v870_v18 = vadd.f32 %v869_v16, %v863_v15  ;;  %v1000_v15 = vld [vmem:[#allocation11 + $0xf0] sm:$0xff]  ;;  %v999_v16 = vld [vmem:[#allocation11 + $0xe8] sm:$0xff] }
 0x4b4   :  { %1048 = vmatpush.msra.mxu2 %v1000_v15 }
 0x4b5   :  { %v871_v25 = vrot.slane %v870_v18, 4 }
 0x4b6   :  { %1049 = vmatpush.msra.mxu2 %v999_v16 }
 0x4b7   :  { %v872_v27 = vadd.f32 %v871_v25, %v870_v18  ;;  %v997_v18 = vld [vmem:[#allocation11 + $0xd8] sm:$0xff]  ;;  %v1212_v25 = vld [vmem:[#allocation2 + $0x28] sm:$0xff] }
 0x4b8   :  { %1050 = vmatpush.msra.mxu2 %v998_v17 }
 0x4b9   :  { %v873_v31 = vrot.slane %v872_v27, 2 }
 0x4ba   :  { %1051 = vmatpush.msra.mxu2 %v997_v18 }
 0x4bb   :  { %v874_v35 = vadd.f32 %v873_v31, %v872_v27  ;;  %v1214_v27 = vld [vmem:[#allocation2 + $0x38] sm:$0xff]  ;;  %v995_v31 = vld [vmem:[#allocation11 + $0xc8] sm:$0xff] }
 0x4bc   :  { %1052 = vmatpush.msra.mxu2 %v996_v30 }
 0x4bd   :  { %v875_v39 = vrot.slane %v874_v35, 1 }
 0x4be   :  { %1053 = vmatpush.msra.mxu2 %v995_v31 }
 0x4bf   :  { %v876_v40 = vadd.f32 %v875_v39, %v874_v35  ;;  %v992_v35 = vld [vmem:[#allocation11 + $0xb0] sm:$0xff]  ;;  %v990_v39 = vld [vmem:[#allocation11 + $0xa0] sm:$0xff] }
 0x4c0   :  { %1054 = vmatpush.msra.mxu2 %v994_v32 }
 0x4c1   :  { %v877_v43 = vmul.f32 %v876_v40, %v1573_v41  ;;  %v1197_v41 = vld [vmem:[%s1743_s10] ss:$0 sm:$0xff]  ;;  %v989_v40 = vld [vmem:[#allocation11 + $0x98] sm:$0xff] }
 0x4c2   :  { %1055 = vmatpush.msra.mxu2 %v993_v34 }
 0x4c3   :  { %v878_v44 = vadd.f32 1e-05, %v877_v43  ;;  %v988_v43 = vld [vmem:[#allocation11 + $0x90] sm:$0xff] }
 0x4c4   :  { %1056 = vmatpush.msra.mxu2 %v992_v35 }
 0x4c5   :  { %1205 = vrsqrt.f32 %v878_v44  ;;  %vm885_vm9 = vweird.f32 %v878_v44 }
 0x4c6   :  { %1057 = vmatpush.msra.mxu2 %v991_v36 }
 0x4c8   :  { %1058 = vmatpush.msra.mxu2 %v990_v39 }
 0x4ca   :  { %1059 = vmatpush.msra.mxu2 %v989_v40 }
 0x4cb   :  { %v1206_v45 = vpop.eup %1205 }
 0x4cc   :  { %v880_v46 = vmul.f32 %v1206_v45, %v878_v44  ;;  %vm886_vm8 = vweird.f32 %v1206_v45  ;;  %1060 = vmatpush.msra.mxu2 %v988_v43  ;;  %v987_v44 = vld [vmem:[#allocation11 + $0x88] sm:$0xff] }
 0x4cd   :  { %vm887_vm10 = vmor %vm885_vm9, %vm886_vm8 }
 0x4ce   :  { %v881_v20 = vmul.f32 %v1206_v45, %v880_v46  ;;  %1061 = vmatpush.msra.mxu2 %v987_v44 }
 0x4d0   :  { %v882_v38 = vmul.f32 0.5, %v881_v20 }
 0x4d2   :  { %v883_v33 = vsub.f32 1.5, %v882_v38 }
 0x4d4   :  { %v884_v47 = vmul.f32 %v1206_v45, %v883_v33 }
 0x4d6   :  { %v888_v29 = vsel %vm887_vm10, %v1206_v45, %v884_v47  ;;  %v986_v45 = vld [vmem:[#allocation11 + $0x80] sm:$0xff] }
 0x4d7   :  { %v896_v21 = vmul.f32 %v888_v29, %v855_v42  ;;  %v889_v51 = vmul.f32 %v888_v29, %v1674_v62  ;;  %v890_v53 = vmul.f32 %v888_v29, %v1676_v63  ;;  %v895_v54 = vmul.f32 %v888_v29, %v1694_v56  ;;  %1062 = vmatpush.msra.mxu2 %v986_v45 }
 0x4d8   :  { %v894_v22 = vmul.f32 %v888_v29, %v1690_v1  ;;  %v893_v55 = vmul.f32 %v888_v29, %v1686_v0  ;;  %v892_v57 = vmul.f32 %v888_v29, %v1680_v9  ;;  %v891_v11 = vmul.f32 %v888_v29, %v1678_v2 }
 0x4d9   :  { %v908_v58 = vmul.f32 %v1196_v24, %v896_v21  ;;  %v901_v59 = vmul.f32 %v1196_v24, %v889_v51  ;;  %v902_v61 = vmul.f32 %v1196_v24, %v890_v53  ;;  %v907_v8 = vmul.f32 %v1196_v24, %v895_v54  ;;  %v1198_v51 = vld [vmem:[%s1745_s12] ss:$0 sm:$0xff]  ;;  %s1402_s12 = smov [#allocation13]  }
 0x4da   :  { %v906_v10 = vmul.f32 %v1196_v24, %v894_v22  ;;  %v905_v3 = vmul.f32 %v1196_v24, %v893_v55  ;;  %v904_v60 = vmul.f32 %v1196_v24, %v892_v57  ;;  %v903_v0 = vmul.f32 %v1196_v24, %v891_v11  ;;  %s1100_s25 = sshll.u32 %s1402_s12, 4  ;;  %s1101_s25 = int_to_ptr.vmem [resolvable:$true] %s1100_s25 }
 0x4db   :  { %v920_v48 = vadd.f32 %v1197_v41, %v908_v58  ;;  %v913_v62 = vadd.f32 %v1197_v41, %v901_v59  ;;  %v914_v19 = vadd.f32 %v1197_v41, %v902_v61  ;;  %v919_v63 = vadd.f32 %v1197_v41, %v907_v8 }
 0x4dc   :  { %v918_v5 = vadd.f32 %v1197_v41, %v906_v10  ;;  %v917_v56 = vadd.f32 %v1197_v41, %v905_v3  ;;  %v916_v37 = vadd.f32 %v1197_v41, %v904_v60  ;;  %v915_v6 = vadd.f32 %v1197_v41, %v903_v0 }
 0x4dd   :  { %v928_v4 = vmax.f32 %v920_v48, 0.0  ;;  %v921_v28 = vmax.f32 %v913_v62, 0.0  ;;  %v922_v1 = vmax.f32 %v914_v19, 0.0  ;;  %v927_v9 = vmax.f32 %v919_v63, 0.0 }
 0x4de   :  { %v926_v52 = vmax.f32 %v918_v5, 0.0  ;;  %v925_v2 = vmax.f32 %v917_v56, 0.0  ;;  %v924_v42 = vmax.f32 %v916_v37, 0.0  ;;  %v923_v7 = vmax.f32 %v915_v6, 0.0 }
 0x4df   :  { %937 = vmatpush.msra.mxu3 %v928_v4  ;;  %1022 = vmatmul.f32.vlgmr.msrb.gmra.mxu0 %v921_v28 }
 0x4e0   :  { %1025 = vmatmul.f32.vlgmr.msra.gmra.mxu1 %v922_v1 }
 0x4e1   :  { %938 = vmatpush.msra.mxu3 %v927_v9 }
 0x4e3   :  { %939 = vmatpush.msra.mxu3 %v926_v52 }
 0x4e5   :  { %940 = vmatpush.msra.mxu3 %v925_v2 }
 0x4e7   :  { %941 = vmatpush.msra.mxu3 %v924_v42 }
 0x4e8   :  { %1028 = vmatmul.f32.gmra.mxu1 %v923_v7 }
 0x4e9   :  { %942 = vmatpush.msra.mxu3 %v923_v7 }
 0x4eb   :  { %943 = vmatpush.msra.mxu3 %v922_v1 }
 0x4ed   :  { %944 = vmatpush.msra.mxu3 %v921_v28 }
 0x4ee   :  { %1142 = vmatmul.msk.f32.vlgmr.msra.gmra.mxu3 %vm155_vm0, %v1207_v49 }
 0x4ef   :  { %1166 = vmatpush.msrb.mxu3 %v1001_v14 }
 0x4f0   :  { %1031 = vmatmul.f32.gmra.mxu1 %v924_v42 }
 0x4f1   :  { %1167 = vmatpush.msrb.mxu3 %v1000_v15 }
 0x4f3   :  { %1168 = vmatpush.msrb.mxu3 %v999_v16 }
 0x4f5   :  { %1169 = vmatpush.msrb.mxu3 %v998_v17 }
 0x4f6   :  { %1143 = vmatmul.msk.f32.gmra.mxu3 %vm155_vm0, %v1208_v50 }
 0x4f7   :  { %1170 = vmatpush.msrb.mxu3 %v997_v18 }
 0x4f8   :  { %1034 = vmatmul.f32.gmra.mxu1 %v925_v2 }
 0x4f9   :  { %1171 = vmatpush.msrb.mxu3 %v996_v30 }
 0x4fb   :  { %1172 = vmatpush.msrb.mxu3 %v995_v31 }
 0x4fd   :  { %1173 = vmatpush.msrb.mxu3 %v994_v32 }
 0x4fe   :  { %1144 = vmatmul.msk.f32.gmra.mxu3 %vm155_vm0, %v1209_v12 }
 0x4ff   :  { %1174 = vmatpush.msrb.mxu3 %v993_v34 }
 0x500   :  { %1037 = vmatmul.f32.gmra.mxu1 %v926_v52 }
 0x501   :  { %1175 = vmatpush.msrb.mxu3 %v992_v35 }
 0x503   :  { %1176 = vmatpush.msrb.mxu3 %v991_v36 }
 0x505   :  { %1177 = vmatpush.msrb.mxu3 %v990_v39 }
 0x506   :  { %1145 = vmatmul.msk.f32.gmra.mxu3 %vm155_vm0, %v1210_v13 }
 0x507   :  { %1178 = vmatpush.msrb.mxu3 %v989_v40 }
 0x508   :  { %1040 = vmatmul.f32.gmra.mxu1 %v927_v9 }
 0x509   :  { %1179 = vmatpush.msrb.mxu3 %v988_v43 }
 0x50b   :  { %1180 = vmatpush.msrb.mxu3 %v987_v44 }
 0x50d   :  { %1181 = vmatpush.msrb.mxu3 %v986_v45 }
 0x50e   :  { %1146 = vmatmul.msk.f32.gmra.mxu3 %vm155_vm0, %v1211_v23 }
 0x510   :  { %1043 = vmatmul.f32.gmra.mxu1 %v928_v4 }
 0x516   :  { %1147 = vmatmul.msk.f32.gmra.mxu3 %vm155_vm0, %v1212_v25 }
 0x51e   :  { %1148 = vmatmul.msk.f32.gmra.mxu3 %vm155_vm0, %v1213_v26 }
 0x526   :  { %1149 = vmatmul.msk.f32.gmra.mxu3 %vm155_vm0, %v1214_v27 }
 0x55c   :  { %v1023_v53 = vpop.f32.mrf.mxu0 }
 0x55d   :  { %v1026_v41 = vpop.f32.mrf.mxu1  ;;  %v1024_v54 = vadd.f32 %v1198_v51, %v1023_v53 }
 0x55e   :  { %v1027_v58 = vadd.f32 %v1198_v51, %v1026_v41 }
 0x565   :  { %v1029_v57 = vpop.f32.mrf.mxu1 }
 0x566   :  { %v1030_v10 = vadd.f32 %v1198_v51, %v1029_v57 }
 0x56d   :  { %v1032_v8 = vpop.f32.mrf.mxu1 }
 0x56e   :  { %v1033_v62 = vadd.f32 %v1198_v51, %v1032_v8 }
 0x571   :  { %v946_v46 = vpop.f32.mrf.mxu3 }
 0x572   :  { %1063 = vmatmul.f32.vlgmr.msra.gmra.mxu2 %v946_v46 }
 0x575   :  { %v1035_v48 = vpop.f32.mrf.mxu1 }
 0x576   :  { %v1036_v60 = vadd.f32 %v1198_v51, %v1035_v48 }
 0x579   :  { %v949_v20 = vpop.f32.mrf.mxu3 }
 0x57a   :  { %1066 = vmatmul.f32.gmra.mxu2 %v949_v20 }
 0x57d   :  { %v1038_v4 = vpop.f32.mrf.mxu1 }
 0x57e   :  { %v1039_v5 = vadd.f32 %v1198_v51, %v1038_v4 }
 0x581   :  { %v952_v38 = vpop.f32.mrf.mxu3 }
 0x582   :  { %1069 = vmatmul.f32.gmra.mxu2 %v952_v38 }
 0x585   :  { %v1041_v56 = vpop.f32.mrf.mxu1 }
 0x586   :  { %v1042_v52 = vadd.f32 %v1198_v51, %v1041_v56 }
 0x589   :  { %v955_v33 = vpop.f32.mrf.mxu3 }
 0x58a   :  { %1072 = vmatmul.f32.gmra.mxu2 %v955_v33 }
 0x58d   :  { %v1044_v2 = vpop.f32.mrf.mxu1 }
 0x58e   :  { %v1045_v42 = vadd.f32 %v1198_v51, %v1044_v2 }
 0x591   :  { %v958_v47 = vpop.f32.mrf.mxu3 }
 0x592   :  { %1075 = vmatmul.f32.gmra.mxu2 %v958_v47 }
 0x599   :  { %v961_v24 = vpop.f32.mrf.mxu3 }
 0x59a   :  { %1078 = vmatmul.f32.gmra.mxu2 %v961_v24 }
 0x5a1   :  { %v964_v29 = vpop.f32.mrf.mxu3 }
 0x5a2   :  { %1081 = vmatmul.f32.gmra.mxu2 %v964_v29 }
 0x5a9   :  { %v967_v21 = vpop.f32.mrf.mxu3 }
 0x5aa   :  { %1084 = vmatmul.f32.vlgmr.msrb.gmra.mxu3 %v967_v21 }
 0x5f5   :  { %v1064_v22 = vpop.f32.mrf.mxu2 }
 0x5f6   :  { %v1065_v55 = vadd.f32 %v1064_v22, %v1024_v54 }
 0x5f8   :  { %1088 = vst [vmem:[#allocation13] sm:$0xff] %v1065_v55 }
 0x5fd   :  { %v1067_v59 = vpop.f32.mrf.mxu2 }
 0x5fe   :  { %v1068_v61 = vadd.f32 %v1067_v59, %v1027_v58 }
 0x600   :  { %1089 = vst [vmem:[#allocation13 + $0x8] sm:$0xff] %v1068_v61 }
 0x605   :  { %v1070_v3 = vpop.f32.mrf.mxu2 }
 0x606   :  { %v1071_v11 = vadd.f32 %v1070_v3, %v1030_v10 }
 0x608   :  { %1090 = vst [vmem:[#allocation13 + $0x10] sm:$0xff] %v1071_v11 }
 0x60d   :  { %v1073_v19 = vpop.f32.mrf.mxu2 }
 0x60e   :  { %v1074_v63 = vadd.f32 %v1073_v19, %v1033_v62 }
 0x610   :  { %1091 = vst [vmem:[#allocation13 + $0x18] sm:$0xff] %v1074_v63 }
 0x615   :  { %v1076_v28 = vpop.f32.mrf.mxu2 }
 0x616   :  { %v1077_v1 = vadd.f32 %v1076_v28, %v1036_v60 }
 0x618   :  { %1092 = vst [vmem:[#allocation13 + $0x20] sm:$0xff] %v1077_v1 }
 0x61d   :  { %v1079_v0 = vpop.f32.mrf.mxu2 }
 0x61e   :  { %v1080_v9 = vadd.f32 %v1079_v0, %v1039_v5 }
 0x620   :  { %1093 = vst [vmem:[#allocation13 + $0x28] sm:$0xff] %v1080_v9 }
 0x625   :  { %v1082_v37 = vpop.f32.mrf.mxu2 }
 0x626   :  { %v1083_v6 = vadd.f32 %v1082_v37, %v1042_v52 }
 0x628   :  { %1094 = vst [vmem:[#allocation13 + $0x30] sm:$0xff] %v1083_v6 }
 0x62d   :  { %v1085_v7 = vpop.f32.mrf.mxu3 }
 0x62e   :  { %v1086_v49 = vadd.f32 %v1085_v7, %v1045_v42 }
 0x630   :  { %1095 = vst [vmem:[#allocation13 + $0x38] sm:$0xff] %v1086_v49 }
 0x631   :  { %1108 = dma.vmem_to_hbm [thread:$0]  %s1101_s25, 1024, %s1103_s27, [#allocation4], %s1394_s16, %s1394_s16, %s1395_s17  }
 0x632   :  { %1391 = dma.done.wait [#allocation4], 1024  }
 0x633   :  { %1392 = vsyncadd [#allocation4], 4294966272 }
 0x634   :  { %1113 = vsyncpa [#allocation3], 1 }
 0x635   :  { %1114 = vsyncpa [#allocation6], 1 }
 0x636   :  { %1115 = vsyncpa [#allocation9], 1 }
 0x637   :  { %1116 = vsyncpa [#allocation12], 1 }
 0x638   :  { %1117 = vsyncpa [#allocation4], 1 }

</bundles_post_ra>
